<compile_context>
chip_gen: v6e
topology: v6e:2x2x1
jax: 0.10.0
libtpu: 0.0.40
codegen_flags: <defaults>
</compile_context>

<pallas_src>
import functools
import math

import jax
import jax.numpy as jnp
from jax import lax
from jax.experimental import pallas as pl
from jax.experimental.pallas import tpu as pltpu


def _gelu_new(x):
    # HF "gelu_new" (tanh approximation) -- ALBERT's default hidden_act.
    c = math.sqrt(2.0 / math.pi)
    return 0.5 * x * (1.0 + jnp.tanh(c * (x + 0.044715 * x * x * x)))


def _layer_norm(x, gamma, beta, eps):
    mu = jnp.mean(x, axis=-1, keepdims=True)
    xc = x - mu
    var = jnp.mean(xc * xc, axis=-1, keepdims=True)
    return xc * lax.rsqrt(var + eps) * gamma + beta


def _albert_layer_kernel(num_heads, head_dim, eps,
                         x_ref,
                         wq_ref, bq_ref, wk_ref, bk_ref, wv_ref, bv_ref,
                         wd_ref, bd_ref, g1_ref, b1_ref,
                         wf_ref, bf_ref, wfo_ref, bfo_ref, g2_ref, b2_ref,
                         out_ref):
    x = x_ref[...].astype(jnp.float32)                       # (S, H)
    s, h = x.shape

    # ---- attention: QKV projections (weights are (in, out)) -------------
    q = jnp.dot(x, wq_ref[...], preferred_element_type=jnp.float32) + bq_ref[...]
    k = jnp.dot(x, wk_ref[...], preferred_element_type=jnp.float32) + bk_ref[...]
    v = jnp.dot(x, wv_ref[...], preferred_element_type=jnp.float32) + bv_ref[...]

    scale = 1.0 / math.sqrt(head_dim)
    wd = wd_ref[...]                                          # (H, H), (in, out)
    proj = jnp.zeros((s, h), jnp.float32)
    for hh in range(num_heads):                               # static unroll
        sl = slice(hh * head_dim, (hh + 1) * head_dim)
        qh, kh, vh = q[:, sl], k[:, sl], v[:, sl]             # (S, hd)
        scores = lax.dot_general(
            qh, kh, (((1,), (1,)), ((), ())),
            preferred_element_type=jnp.float32) * scale       # (S, S)
        scores = scores - jnp.max(scores, axis=-1, keepdims=True)
        p = jnp.exp(scores)
        p = p / jnp.sum(p, axis=-1, keepdims=True)
        # attention dropout: eval-mode identity
        ctx = jnp.dot(p, vh, preferred_element_type=jnp.float32)        # (S, hd)
        # einsum('bfnd,ndh->bfh', ctx, dense.weight.t().view(nh, hd, H))
        proj = proj + jnp.dot(ctx, wd[sl, :],
                              preferred_element_type=jnp.float32)       # (S, H)
    proj = proj + bd_ref[...]
    # output dropout: eval-mode identity
    attn_out = _layer_norm(x + proj, g1_ref[...], b1_ref[...], eps)

    # ---- FFN --------------------------------------------------------------
    ff = jnp.dot(attn_out, wf_ref[...], preferred_element_type=jnp.float32) + bf_ref[...]
    ff = _gelu_new(ff)
    ff = jnp.dot(ff, wfo_ref[...], preferred_element_type=jnp.float32) + bfo_ref[...]
    # hidden dropout: eval-mode identity
    out = _layer_norm(ff + attn_out, g2_ref[...], b2_ref[...], eps)
    out_ref[...] = out.astype(out_ref.dtype)


def albert_layer_pallas(hidden, params, num_heads, layer_norm_eps):
    """One AlbertLayer forward: attention + FFN, fused in a single kernel."""
    B, S, H = hidden.shape
    head_dim = H // num_heads
    inter = params["wf"].shape[1]

    row = lambda a: a.reshape(1, -1)                 # biases / LN params -> (1, N)
    full = lambda shape: pl.BlockSpec(shape, lambda b: (0, 0))   # resident weight

    kernel = functools.partial(_albert_layer_kernel, num_heads, head_dim,
                               float(layer_norm_eps))

    grid_spec = pltpu.PrefetchScalarGridSpec(
        num_scalar_prefetch=0,
        grid=(B,),
        in_specs=[
            pl.BlockSpec((None, S, H), lambda b: (b, 0, 0)),   # hidden (S, H) tile
            full((H, H)), full((1, H)),                        # Wq^T, bq
            full((H, H)), full((1, H)),                        # Wk^T, bk
            full((H, H)), full((1, H)),                        # Wv^T, bv
            full((H, H)), full((1, H)),                        # Wdense^T, bd
            full((1, H)), full((1, H)),                        # attn LN gamma/beta
            full((H, inter)), full((1, inter)),                # Wffn^T, bffn
            full((inter, H)), full((1, H)),                    # Wffn_out^T, bffn_out
            full((1, H)), full((1, H)),                        # full-layer LN gamma/beta
        ],
        out_specs=pl.BlockSpec((None, S, H), lambda b: (b, 0, 0)),
    )

    return pl.pallas_call(
        kernel,
        out_shape=jax.ShapeDtypeStruct((B, S, H), hidden.dtype),
        grid_spec=grid_spec,
        compiler_params=pltpu.CompilerParams(
            dimension_semantics=("parallel",)),
    )(hidden,
      params["wq"], row(params["bq"]),
      params["wk"], row(params["bk"]),
      params["wv"], row(params["bv"]),
      params["wd"], row(params["bd"]),
      row(params["ln1_g"]), row(params["ln1_b"]),
      params["wf"], row(params["bf"]),
      params["wfo"], row(params["bfo"]),
      row(params["ln2_g"]), row(params["ln2_b"]))


def albert_layer_group_pallas(hidden, layer_params, num_heads, layer_norm_eps):
    for p in layer_params:
        hidden = albert_layer_pallas(hidden, p, num_heads, layer_norm_eps)
    return hidden


# ----------------------------- pure-JAX reference ---------------------------
def _ln_ref(v, g, b, eps):
    mu = v.mean(-1, keepdims=True)
    var = ((v - mu) ** 2).mean(-1, keepdims=True)
    return (v - mu) * lax.rsqrt(var + eps) * g + b


def albert_layer_ref(x, p, num_heads, eps):
    B, S, H = x.shape
    hd = H // num_heads
    q = x @ p["wq"] + p["bq"]
    k = x @ p["wk"] + p["bk"]
    v = x @ p["wv"] + p["bv"]
    split = lambda t: t.reshape(B, S, num_heads, hd).transpose(0, 2, 1, 3)
    qh, kh, vh = split(q), split(k), split(v)
    scores = jnp.einsum("bnqd,bnkd->bnqk", qh, kh) / math.sqrt(hd)
    probs = jax.nn.softmax(scores, axis=-1)
    ctx = jnp.einsum("bnqk,bnkd->bnqd", probs, vh)
    ctx = ctx.transpose(0, 2, 1, 3).reshape(B, S, H)
    proj = ctx @ p["wd"] + p["bd"]
    attn_out = _ln_ref(x + proj, p["ln1_g"], p["ln1_b"], eps)
    ff = _gelu_new(attn_out @ p["wf"] + p["bf"])
    ff = ff @ p["wfo"] + p["bfo"]
    return _ln_ref(ff + attn_out, p["ln2_g"], p["ln2_b"], eps)


def albert_layer_group_ref(x, layer_params, num_heads, eps):
    for p in layer_params:
        x = albert_layer_ref(x, p, num_heads, eps)
    return x


if __name__ == "__main__":
    # Small ALBERT-ish config.  H=128 keeps the last dim lane-dense.
    B, S = 2, 8
    H = 128                     # hidden_size
    num_heads = 4               # head_dim = 32
    intermediate = 256          # intermediate_size
    inner_group_num = 2
    layer_norm_eps = 1e-12

    key = jax.random.PRNGKey(0)
    key, kx = jax.random.split(key)
    hidden = 0.5 * jax.random.normal(kx, (B, S, H), dtype=jnp.float32)

    def make_layer(k):
        ks = jax.random.split(k, 14)
        n = lambda kk, shape: 0.02 * jax.random.normal(kk, shape, dtype=jnp.float32)
        return {
            "wq": n(ks[0], (H, H)), "bq": n(ks[1], (H,)),
            "wk": n(ks[2], (H, H)), "bk": n(ks[3], (H,)),
            "wv": n(ks[4], (H, H)), "bv": n(ks[5], (H,)),
            "wd": n(ks[6], (H, H)), "bd": n(ks[7], (H,)),
            "ln1_g": 1.0 + n(ks[8], (H,)), "ln1_b": n(ks[9], (H,)),
            "wf": n(ks[10], (H, intermediate)), "bf": n(ks[11], (intermediate,)),
            "wfo": n(ks[12], (intermediate, H)), "bfo": n(ks[13], (H,)),
            "ln2_g": jnp.ones((H,), jnp.float32),
            "ln2_b": jnp.zeros((H,), jnp.float32),
        }

    layer_keys = jax.random.split(key, inner_group_num)
    layer_params = [make_layer(k) for k in layer_keys]

    out = albert_layer_group_pallas(hidden, layer_params, num_heads, layer_norm_eps)
    out = jax.block_until_ready(out)

    ref = albert_layer_group_ref(hidden, layer_params, num_heads, layer_norm_eps)
    assert out.shape == (B, S, H)
    max_err = float(jnp.max(jnp.abs(out - ref)))
    assert jnp.allclose(out, ref, atol=2e-4, rtol=2e-4), f"mismatch vs reference, max_err={max_err}"

    print("KERNEL_OK")
</pallas_src>

<mosaic_0001>
module attributes {stable_mosaic.version = 11 : i64} {
  func.func @_albert_layer_kernel(%arg0: i32, %arg1: memref<1x8x128xf32, #tpu.memory_space<vmem>>, %arg2: memref<128x128xf32, #tpu.memory_space<vmem>>, %arg3: memref<1x128xf32, #tpu.memory_space<vmem>>, %arg4: memref<128x128xf32, #tpu.memory_space<vmem>>, %arg5: memref<1x128xf32, #tpu.memory_space<vmem>>, %arg6: memref<128x128xf32, #tpu.memory_space<vmem>>, %arg7: memref<1x128xf32, #tpu.memory_space<vmem>>, %arg8: memref<128x128xf32, #tpu.memory_space<vmem>>, %arg9: memref<1x128xf32, #tpu.memory_space<vmem>>, %arg10: memref<1x128xf32, #tpu.memory_space<vmem>>, %arg11: memref<1x128xf32, #tpu.memory_space<vmem>>, %arg12: memref<128x256xf32, #tpu.memory_space<vmem>>, %arg13: memref<1x256xf32, #tpu.memory_space<vmem>>, %arg14: memref<256x128xf32, #tpu.memory_space<vmem>>, %arg15: memref<1x128xf32, #tpu.memory_space<vmem>>, %arg16: memref<1x128xf32, #tpu.memory_space<vmem>>, %arg17: memref<1x128xf32, #tpu.memory_space<vmem>>, %arg18: memref<1x8x128xf32, #tpu.memory_space<vmem>>) attributes {dimension_semantics = [#tpu.dimension_semantics<parallel>], iteration_bounds = array<i64: 2>, scalar_prefetch = 0 : i64, scratch_operands = 0 : i64, tpu.core_type = #tpu.core_type<tc>, window_params = [{transform_indices = @transform_0, window_bounds = array<i64: 1, 8, 128>}, {pipeline_mode = #tpu.pipeline_mode<synchronous>, transform_indices = @transform_1, window_bounds = array<i64: 128, 128>}, {pipeline_mode = #tpu.pipeline_mode<synchronous>, transform_indices = @transform_2, window_bounds = array<i64: 1, 128>}, {pipeline_mode = #tpu.pipeline_mode<synchronous>, transform_indices = @transform_3, window_bounds = array<i64: 128, 128>}, {pipeline_mode = #tpu.pipeline_mode<synchronous>, transform_indices = @transform_4, window_bounds = array<i64: 1, 128>}, {pipeline_mode = #tpu.pipeline_mode<synchronous>, transform_indices = @transform_5, window_bounds = array<i64: 128, 128>}, {pipeline_mode = #tpu.pipeline_mode<synchronous>, transform_indices = @transform_6, window_bounds = array<i64: 1, 128>}, {pipeline_mode = #tpu.pipeline_mode<synchronous>, transform_indices = @transform_7, window_bounds = array<i64: 128, 128>}, {pipeline_mode = #tpu.pipeline_mode<synchronous>, transform_indices = @transform_8, window_bounds = array<i64: 1, 128>}, {pipeline_mode = #tpu.pipeline_mode<synchronous>, transform_indices = @transform_9, window_bounds = array<i64: 1, 128>}, {pipeline_mode = #tpu.pipeline_mode<synchronous>, transform_indices = @transform_10, window_bounds = array<i64: 1, 128>}, {pipeline_mode = #tpu.pipeline_mode<synchronous>, transform_indices = @transform_11, window_bounds = array<i64: 128, 256>}, {pipeline_mode = #tpu.pipeline_mode<synchronous>, transform_indices = @transform_12, window_bounds = array<i64: 1, 256>}, {pipeline_mode = #tpu.pipeline_mode<synchronous>, transform_indices = @transform_13, window_bounds = array<i64: 256, 128>}, {pipeline_mode = #tpu.pipeline_mode<synchronous>, transform_indices = @transform_14, window_bounds = array<i64: 1, 128>}, {pipeline_mode = #tpu.pipeline_mode<synchronous>, transform_indices = @transform_15, window_bounds = array<i64: 1, 128>}, {pipeline_mode = #tpu.pipeline_mode<synchronous>, transform_indices = @transform_16, window_bounds = array<i64: 1, 128>}, {transform_indices = @transform_17, window_bounds = array<i64: 1, 8, 128>}]} {
    %c0 = arith.constant 0 : index
    %c0_0 = arith.constant 0 : index
    %c0_1 = arith.constant 0 : index
    %0 = vector.load %arg1[%c0, %c0_0, %c0_1] : memref<1x8x128xf32, #tpu.memory_space<vmem>>, vector<1x8x128xf32>
    %1 = vector.shape_cast %0 : vector<1x8x128xf32> to vector<8x128xf32>
    %c0_2 = arith.constant 0 : index
    %c0_3 = arith.constant 0 : index
    %2 = vector.load %arg2[%c0_2, %c0_3] : memref<128x128xf32, #tpu.memory_space<vmem>>, vector<128x128xf32>
    %cst = arith.constant dense<0.000000e+00> : vector<8x128xf32>
    %3 = tpu.matmul %1, %2, %cst {dimension_numbers = #tpu.dot_dimension_numbers<[1], [0], [0], [1], [0, 0, 1, 1], [], []>} : vector<8x128xf32>, vector<128x128xf32>, vector<8x128xf32> -> vector<8x128xf32>
    %c0_4 = arith.constant 0 : index
    %c0_5 = arith.constant 0 : index
    %4 = vector.load %arg3[%c0_4, %c0_5] : memref<1x128xf32, #tpu.memory_space<vmem>>, vector<1x128xf32>
    %5 = vector.broadcast %4 : vector<1x128xf32> to vector<8x128xf32>
    %6 = arith.addf %3, %5 : vector<8x128xf32>
    %c0_6 = arith.constant 0 : index
    %c0_7 = arith.constant 0 : index
    %7 = vector.load %arg4[%c0_6, %c0_7] : memref<128x128xf32, #tpu.memory_space<vmem>>, vector<128x128xf32>
    %cst_8 = arith.constant dense<0.000000e+00> : vector<8x128xf32>
    %8 = tpu.matmul %1, %7, %cst_8 {dimension_numbers = #tpu.dot_dimension_numbers<[1], [0], [0], [1], [0, 0, 1, 1], [], []>} : vector<8x128xf32>, vector<128x128xf32>, vector<8x128xf32> -> vector<8x128xf32>
    %c0_9 = arith.constant 0 : index
    %c0_10 = arith.constant 0 : index
    %9 = vector.load %arg5[%c0_9, %c0_10] : memref<1x128xf32, #tpu.memory_space<vmem>>, vector<1x128xf32>
    %10 = vector.broadcast %9 : vector<1x128xf32> to vector<8x128xf32>
    %11 = arith.addf %8, %10 : vector<8x128xf32>
    %c0_11 = arith.constant 0 : index
    %c0_12 = arith.constant 0 : index
    %12 = vector.load %arg6[%c0_11, %c0_12] : memref<128x128xf32, #tpu.memory_space<vmem>>, vector<128x128xf32>
    %cst_13 = arith.constant dense<0.000000e+00> : vector<8x128xf32>
    %13 = tpu.matmul %1, %12, %cst_13 {dimension_numbers = #tpu.dot_dimension_numbers<[1], [0], [0], [1], [0, 0, 1, 1], [], []>} : vector<8x128xf32>, vector<128x128xf32>, vector<8x128xf32> -> vector<8x128xf32>
    %c0_14 = arith.constant 0 : index
    %c0_15 = arith.constant 0 : index
    %14 = vector.load %arg7[%c0_14, %c0_15] : memref<1x128xf32, #tpu.memory_space<vmem>>, vector<1x128xf32>
    %15 = vector.broadcast %14 : vector<1x128xf32> to vector<8x128xf32>
    %16 = arith.addf %13, %15 : vector<8x128xf32>
    %c0_16 = arith.constant 0 : index
    %c0_17 = arith.constant 0 : index
    %17 = vector.load %arg8[%c0_16, %c0_17] : memref<128x128xf32, #tpu.memory_space<vmem>>, vector<128x128xf32>
    %cst_18 = arith.constant 0.000000e+00 : f32
    %18 = vector.broadcast %cst_18 : f32 to vector<8x128xf32>
    %19 = vector.extract_strided_slice %6 {offsets = [0, 0], sizes = [8, 32], strides = [1, 1]} : vector<8x128xf32> to vector<8x32xf32>
    %20 = vector.extract_strided_slice %11 {offsets = [0, 0], sizes = [8, 32], strides = [1, 1]} : vector<8x128xf32> to vector<8x32xf32>
    %21 = vector.extract_strided_slice %16 {offsets = [0, 0], sizes = [8, 32], strides = [1, 1]} : vector<8x128xf32> to vector<8x32xf32>
    %cst_19 = arith.constant dense<0.000000e+00> : vector<8x8xf32>
    %22 = tpu.matmul %19, %20, %cst_19 {dimension_numbers = #tpu.dot_dimension_numbers<[1], [1], [0], [0], [0, 0, 1, 0], [], []>} : vector<8x32xf32>, vector<8x32xf32>, vector<8x8xf32> -> vector<8x8xf32>
    %cst_20 = arith.constant 0.176776692 : f32
    %23 = vector.broadcast %cst_20 : f32 to vector<8x8xf32>
    %24 = arith.mulf %22, %23 : vector<8x8xf32>
    %cst_21 = arith.constant dense<0xFF800000> : vector<8xf32>
    %25 = vector.multi_reduction <maximumf>, %24, %cst_21 [1] : vector<8x8xf32> to vector<8xf32>
    %26 = vector.shape_cast %25 : vector<8xf32> to vector<8x1xf32>
    %27 = vector.broadcast %26 : vector<8x1xf32> to vector<8x8xf32>
    %28 = arith.subf %24, %27 : vector<8x8xf32>
    %29 = math.exp %28 : vector<8x8xf32>
    %cst_22 = arith.constant dense<0.000000e+00> : vector<8xf32>
    %30 = vector.multi_reduction <add>, %29, %cst_22 [1] : vector<8x8xf32> to vector<8xf32>
    %31 = vector.shape_cast %30 : vector<8xf32> to vector<8x1xf32>
    %32 = vector.broadcast %31 : vector<8x1xf32> to vector<8x8xf32>
    %33 = arith.divf %29, %32 : vector<8x8xf32>
    %cst_23 = arith.constant dense<0.000000e+00> : vector<8x32xf32>
    %34 = tpu.matmul %33, %21, %cst_23 {dimension_numbers = #tpu.dot_dimension_numbers<[1], [0], [0], [1], [0, 0, 1, 1], [], []>} : vector<8x8xf32>, vector<8x32xf32>, vector<8x32xf32> -> vector<8x32xf32>
    %35 = vector.extract_strided_slice %17 {offsets = [0, 0], sizes = [32, 128], strides = [1, 1]} : vector<128x128xf32> to vector<32x128xf32>
    %cst_24 = arith.constant dense<0.000000e+00> : vector<8x128xf32>
    %36 = tpu.matmul %34, %35, %cst_24 {dimension_numbers = #tpu.dot_dimension_numbers<[1], [0], [0], [1], [0, 0, 1, 1], [], []>} : vector<8x32xf32>, vector<32x128xf32>, vector<8x128xf32> -> vector<8x128xf32>
    %37 = arith.addf %18, %36 : vector<8x128xf32>
    %38 = vector.extract_strided_slice %6 {offsets = [0, 32], sizes = [8, 32], strides = [1, 1]} : vector<8x128xf32> to vector<8x32xf32>
    %39 = vector.extract_strided_slice %11 {offsets = [0, 32], sizes = [8, 32], strides = [1, 1]} : vector<8x128xf32> to vector<8x32xf32>
    %40 = vector.extract_strided_slice %16 {offsets = [0, 32], sizes = [8, 32], strides = [1, 1]} : vector<8x128xf32> to vector<8x32xf32>
    %cst_25 = arith.constant dense<0.000000e+00> : vector<8x8xf32>
    %41 = tpu.matmul %38, %39, %cst_25 {dimension_numbers = #tpu.dot_dimension_numbers<[1], [1], [0], [0], [0, 0, 1, 0], [], []>} : vector<8x32xf32>, vector<8x32xf32>, vector<8x8xf32> -> vector<8x8xf32>
    %cst_26 = arith.constant 0.176776692 : f32
    %42 = vector.broadcast %cst_26 : f32 to vector<8x8xf32>
    %43 = arith.mulf %41, %42 : vector<8x8xf32>
    %cst_27 = arith.constant dense<0xFF800000> : vector<8xf32>
    %44 = vector.multi_reduction <maximumf>, %43, %cst_27 [1] : vector<8x8xf32> to vector<8xf32>
    %45 = vector.shape_cast %44 : vector<8xf32> to vector<8x1xf32>
    %46 = vector.broadcast %45 : vector<8x1xf32> to vector<8x8xf32>
    %47 = arith.subf %43, %46 : vector<8x8xf32>
    %48 = math.exp %47 : vector<8x8xf32>
    %cst_28 = arith.constant dense<0.000000e+00> : vector<8xf32>
    %49 = vector.multi_reduction <add>, %48, %cst_28 [1] : vector<8x8xf32> to vector<8xf32>
    %50 = vector.shape_cast %49 : vector<8xf32> to vector<8x1xf32>
    %51 = vector.broadcast %50 : vector<8x1xf32> to vector<8x8xf32>
    %52 = arith.divf %48, %51 : vector<8x8xf32>
    %cst_29 = arith.constant dense<0.000000e+00> : vector<8x32xf32>
    %53 = tpu.matmul %52, %40, %cst_29 {dimension_numbers = #tpu.dot_dimension_numbers<[1], [0], [0], [1], [0, 0, 1, 1], [], []>} : vector<8x8xf32>, vector<8x32xf32>, vector<8x32xf32> -> vector<8x32xf32>
    %54 = vector.extract_strided_slice %17 {offsets = [32, 0], sizes = [32, 128], strides = [1, 1]} : vector<128x128xf32> to vector<32x128xf32>
    %cst_30 = arith.constant dense<0.000000e+00> : vector<8x128xf32>
    %55 = tpu.matmul %53, %54, %cst_30 {dimension_numbers = #tpu.dot_dimension_numbers<[1], [0], [0], [1], [0, 0, 1, 1], [], []>} : vector<8x32xf32>, vector<32x128xf32>, vector<8x128xf32> -> vector<8x128xf32>
    %56 = arith.addf %37, %55 : vector<8x128xf32>
    %57 = vector.extract_strided_slice %6 {offsets = [0, 64], sizes = [8, 32], strides = [1, 1]} : vector<8x128xf32> to vector<8x32xf32>
    %58 = vector.extract_strided_slice %11 {offsets = [0, 64], sizes = [8, 32], strides = [1, 1]} : vector<8x128xf32> to vector<8x32xf32>
    %59 = vector.extract_strided_slice %16 {offsets = [0, 64], sizes = [8, 32], strides = [1, 1]} : vector<8x128xf32> to vector<8x32xf32>
    %cst_31 = arith.constant dense<0.000000e+00> : vector<8x8xf32>
    %60 = tpu.matmul %57, %58, %cst_31 {dimension_numbers = #tpu.dot_dimension_numbers<[1], [1], [0], [0], [0, 0, 1, 0], [], []>} : vector<8x32xf32>, vector<8x32xf32>, vector<8x8xf32> -> vector<8x8xf32>
    %cst_32 = arith.constant 0.176776692 : f32
    %61 = vector.broadcast %cst_32 : f32 to vector<8x8xf32>
    %62 = arith.mulf %60, %61 : vector<8x8xf32>
    %cst_33 = arith.constant dense<0xFF800000> : vector<8xf32>
    %63 = vector.multi_reduction <maximumf>, %62, %cst_33 [1] : vector<8x8xf32> to vector<8xf32>
    %64 = vector.shape_cast %63 : vector<8xf32> to vector<8x1xf32>
    %65 = vector.broadcast %64 : vector<8x1xf32> to vector<8x8xf32>
    %66 = arith.subf %62, %65 : vector<8x8xf32>
    %67 = math.exp %66 : vector<8x8xf32>
    %cst_34 = arith.constant dense<0.000000e+00> : vector<8xf32>
    %68 = vector.multi_reduction <add>, %67, %cst_34 [1] : vector<8x8xf32> to vector<8xf32>
    %69 = vector.shape_cast %68 : vector<8xf32> to vector<8x1xf32>
    %70 = vector.broadcast %69 : vector<8x1xf32> to vector<8x8xf32>
    %71 = arith.divf %67, %70 : vector<8x8xf32>
    %cst_35 = arith.constant dense<0.000000e+00> : vector<8x32xf32>
    %72 = tpu.matmul %71, %59, %cst_35 {dimension_numbers = #tpu.dot_dimension_numbers<[1], [0], [0], [1], [0, 0, 1, 1], [], []>} : vector<8x8xf32>, vector<8x32xf32>, vector<8x32xf32> -> vector<8x32xf32>
    %73 = vector.extract_strided_slice %17 {offsets = [64, 0], sizes = [32, 128], strides = [1, 1]} : vector<128x128xf32> to vector<32x128xf32>
    %cst_36 = arith.constant dense<0.000000e+00> : vector<8x128xf32>
    %74 = tpu.matmul %72, %73, %cst_36 {dimension_numbers = #tpu.dot_dimension_numbers<[1], [0], [0], [1], [0, 0, 1, 1], [], []>} : vector<8x32xf32>, vector<32x128xf32>, vector<8x128xf32> -> vector<8x128xf32>
    %75 = arith.addf %56, %74 : vector<8x128xf32>
    %76 = vector.extract_strided_slice %6 {offsets = [0, 96], sizes = [8, 32], strides = [1, 1]} : vector<8x128xf32> to vector<8x32xf32>
    %77 = vector.extract_strided_slice %11 {offsets = [0, 96], sizes = [8, 32], strides = [1, 1]} : vector<8x128xf32> to vector<8x32xf32>
    %78 = vector.extract_strided_slice %16 {offsets = [0, 96], sizes = [8, 32], strides = [1, 1]} : vector<8x128xf32> to vector<8x32xf32>
    %cst_37 = arith.constant dense<0.000000e+00> : vector<8x8xf32>
    %79 = tpu.matmul %76, %77, %cst_37 {dimension_numbers = #tpu.dot_dimension_numbers<[1], [1], [0], [0], [0, 0, 1, 0], [], []>} : vector<8x32xf32>, vector<8x32xf32>, vector<8x8xf32> -> vector<8x8xf32>
    %cst_38 = arith.constant 0.176776692 : f32
    %80 = vector.broadcast %cst_38 : f32 to vector<8x8xf32>
    %81 = arith.mulf %79, %80 : vector<8x8xf32>
    %cst_39 = arith.constant dense<0xFF800000> : vector<8xf32>
    %82 = vector.multi_reduction <maximumf>, %81, %cst_39 [1] : vector<8x8xf32> to vector<8xf32>
    %83 = vector.shape_cast %82 : vector<8xf32> to vector<8x1xf32>
    %84 = vector.broadcast %83 : vector<8x1xf32> to vector<8x8xf32>
    %85 = arith.subf %81, %84 : vector<8x8xf32>
    %86 = math.exp %85 : vector<8x8xf32>
    %cst_40 = arith.constant dense<0.000000e+00> : vector<8xf32>
    %87 = vector.multi_reduction <add>, %86, %cst_40 [1] : vector<8x8xf32> to vector<8xf32>
    %88 = vector.shape_cast %87 : vector<8xf32> to vector<8x1xf32>
    %89 = vector.broadcast %88 : vector<8x1xf32> to vector<8x8xf32>
    %90 = arith.divf %86, %89 : vector<8x8xf32>
    %cst_41 = arith.constant dense<0.000000e+00> : vector<8x32xf32>
    %91 = tpu.matmul %90, %78, %cst_41 {dimension_numbers = #tpu.dot_dimension_numbers<[1], [0], [0], [1], [0, 0, 1, 1], [], []>} : vector<8x8xf32>, vector<8x32xf32>, vector<8x32xf32> -> vector<8x32xf32>
    %92 = vector.extract_strided_slice %17 {offsets = [96, 0], sizes = [32, 128], strides = [1, 1]} : vector<128x128xf32> to vector<32x128xf32>
    %cst_42 = arith.constant dense<0.000000e+00> : vector<8x128xf32>
    %93 = tpu.matmul %91, %92, %cst_42 {dimension_numbers = #tpu.dot_dimension_numbers<[1], [0], [0], [1], [0, 0, 1, 1], [], []>} : vector<8x32xf32>, vector<32x128xf32>, vector<8x128xf32> -> vector<8x128xf32>
    %94 = arith.addf %75, %93 : vector<8x128xf32>
    %c0_43 = arith.constant 0 : index
    %c0_44 = arith.constant 0 : index
    %95 = vector.load %arg9[%c0_43, %c0_44] : memref<1x128xf32, #tpu.memory_space<vmem>>, vector<1x128xf32>
    %96 = vector.broadcast %95 : vector<1x128xf32> to vector<8x128xf32>
    %97 = arith.addf %94, %96 : vector<8x128xf32>
    %98 = arith.addf %1, %97 : vector<8x128xf32>
    %c0_45 = arith.constant 0 : index
    %c0_46 = arith.constant 0 : index
    %99 = vector.load %arg10[%c0_45, %c0_46] : memref<1x128xf32, #tpu.memory_space<vmem>>, vector<1x128xf32>
    %c0_47 = arith.constant 0 : index
    %c0_48 = arith.constant 0 : index
    %100 = vector.load %arg11[%c0_47, %c0_48] : memref<1x128xf32, #tpu.memory_space<vmem>>, vector<1x128xf32>
    %cst_49 = arith.constant dense<0.000000e+00> : vector<8xf32>
    %101 = vector.multi_reduction <add>, %98, %cst_49 [1] : vector<8x128xf32> to vector<8xf32>
    %102 = vector.shape_cast %101 : vector<8xf32> to vector<8x1xf32>
    %cst_50 = arith.constant 1.280000e+02 : f32
    %103 = vector.broadcast %cst_50 : f32 to vector<8x1xf32>
    %104 = arith.divf %102, %103 : vector<8x1xf32>
    %105 = vector.broadcast %104 : vector<8x1xf32> to vector<8x128xf32>
    %106 = arith.subf %98, %105 : vector<8x128xf32>
    %107 = arith.mulf %106, %106 : vector<8x128xf32>
    %cst_51 = arith.constant dense<0.000000e+00> : vector<8xf32>
    %108 = vector.multi_reduction <add>, %107, %cst_51 [1] : vector<8x128xf32> to vector<8xf32>
    %109 = vector.shape_cast %108 : vector<8xf32> to vector<8x1xf32>
    %cst_52 = arith.constant 1.280000e+02 : f32
    %110 = vector.broadcast %cst_52 : f32 to vector<8x1xf32>
    %111 = arith.divf %109, %110 : vector<8x1xf32>
    %cst_53 = arith.constant 9.99999996E-13 : f32
    %112 = vector.broadcast %cst_53 : f32 to vector<8x1xf32>
    %113 = arith.addf %111, %112 : vector<8x1xf32>
    %114 = math.rsqrt %113 : vector<8x1xf32>
    %115 = vector.broadcast %114 : vector<8x1xf32> to vector<8x128xf32>
    %116 = arith.mulf %106, %115 : vector<8x128xf32>
    %117 = vector.broadcast %99 : vector<1x128xf32> to vector<8x128xf32>
    %118 = arith.mulf %116, %117 : vector<8x128xf32>
    %119 = vector.broadcast %100 : vector<1x128xf32> to vector<8x128xf32>
    %120 = arith.addf %118, %119 : vector<8x128xf32>
    %c0_54 = arith.constant 0 : index
    %c0_55 = arith.constant 0 : index
    %121 = vector.load %arg12[%c0_54, %c0_55] : memref<128x256xf32, #tpu.memory_space<vmem>>, vector<128x256xf32>
    %cst_56 = arith.constant dense<0.000000e+00> : vector<8x256xf32>
    %122 = tpu.matmul %120, %121, %cst_56 {dimension_numbers = #tpu.dot_dimension_numbers<[1], [0], [0], [1], [0, 0, 1, 1], [], []>} : vector<8x128xf32>, vector<128x256xf32>, vector<8x256xf32> -> vector<8x256xf32>
    %c0_57 = arith.constant 0 : index
    %c0_58 = arith.constant 0 : index
    %123 = vector.load %arg13[%c0_57, %c0_58] : memref<1x256xf32, #tpu.memory_space<vmem>>, vector<1x256xf32>
    %124 = vector.broadcast %123 : vector<1x256xf32> to vector<8x256xf32>
    %125 = arith.addf %122, %124 : vector<8x256xf32>
    %cst_59 = arith.constant 5.000000e-01 : f32
    %126 = vector.broadcast %cst_59 : f32 to vector<8x256xf32>
    %127 = arith.mulf %126, %125 : vector<8x256xf32>
    %cst_60 = arith.constant 4.471500e-02 : f32
    %128 = vector.broadcast %cst_60 : f32 to vector<8x256xf32>
    %129 = arith.mulf %128, %125 : vector<8x256xf32>
    %130 = arith.mulf %129, %125 : vector<8x256xf32>
    %131 = arith.mulf %130, %125 : vector<8x256xf32>
    %132 = arith.addf %125, %131 : vector<8x256xf32>
    %cst_61 = arith.constant 0.797884583 : f32
    %133 = vector.broadcast %cst_61 : f32 to vector<8x256xf32>
    %134 = arith.mulf %133, %132 : vector<8x256xf32>
    %135 = math.tanh %134 : vector<8x256xf32>
    %cst_62 = arith.constant 1.000000e+00 : f32
    %136 = vector.broadcast %cst_62 : f32 to vector<8x256xf32>
    %137 = arith.addf %136, %135 : vector<8x256xf32>
    %138 = arith.mulf %127, %137 : vector<8x256xf32>
    %c0_63 = arith.constant 0 : index
    %c0_64 = arith.constant 0 : index
    %139 = vector.load %arg14[%c0_63, %c0_64] : memref<256x128xf32, #tpu.memory_space<vmem>>, vector<256x128xf32>
    %cst_65 = arith.constant dense<0.000000e+00> : vector<8x128xf32>
    %140 = tpu.matmul %138, %139, %cst_65 {dimension_numbers = #tpu.dot_dimension_numbers<[1], [0], [0], [1], [0, 0, 1, 1], [], []>} : vector<8x256xf32>, vector<256x128xf32>, vector<8x128xf32> -> vector<8x128xf32>
    %c0_66 = arith.constant 0 : index
    %c0_67 = arith.constant 0 : index
    %141 = vector.load %arg15[%c0_66, %c0_67] : memref<1x128xf32, #tpu.memory_space<vmem>>, vector<1x128xf32>
    %142 = vector.broadcast %141 : vector<1x128xf32> to vector<8x128xf32>
    %143 = arith.addf %140, %142 : vector<8x128xf32>
    %144 = arith.addf %143, %120 : vector<8x128xf32>
    %c0_68 = arith.constant 0 : index
    %c0_69 = arith.constant 0 : index
    %145 = vector.load %arg16[%c0_68, %c0_69] : memref<1x128xf32, #tpu.memory_space<vmem>>, vector<1x128xf32>
    %c0_70 = arith.constant 0 : index
    %c0_71 = arith.constant 0 : index
    %146 = vector.load %arg17[%c0_70, %c0_71] : memref<1x128xf32, #tpu.memory_space<vmem>>, vector<1x128xf32>
    %cst_72 = arith.constant dense<0.000000e+00> : vector<8xf32>
    %147 = vector.multi_reduction <add>, %144, %cst_72 [1] : vector<8x128xf32> to vector<8xf32>
    %148 = vector.shape_cast %147 : vector<8xf32> to vector<8x1xf32>
    %cst_73 = arith.constant 1.280000e+02 : f32
    %149 = vector.broadcast %cst_73 : f32 to vector<8x1xf32>
    %150 = arith.divf %148, %149 : vector<8x1xf32>
    %151 = vector.broadcast %150 : vector<8x1xf32> to vector<8x128xf32>
    %152 = arith.subf %144, %151 : vector<8x128xf32>
    %153 = arith.mulf %152, %152 : vector<8x128xf32>
    %cst_74 = arith.constant dense<0.000000e+00> : vector<8xf32>
    %154 = vector.multi_reduction <add>, %153, %cst_74 [1] : vector<8x128xf32> to vector<8xf32>
    %155 = vector.shape_cast %154 : vector<8xf32> to vector<8x1xf32>
    %cst_75 = arith.constant 1.280000e+02 : f32
    %156 = vector.broadcast %cst_75 : f32 to vector<8x1xf32>
    %157 = arith.divf %155, %156 : vector<8x1xf32>
    %cst_76 = arith.constant 9.99999996E-13 : f32
    %158 = vector.broadcast %cst_76 : f32 to vector<8x1xf32>
    %159 = arith.addf %157, %158 : vector<8x1xf32>
    %160 = math.rsqrt %159 : vector<8x1xf32>
    %161 = vector.broadcast %160 : vector<8x1xf32> to vector<8x128xf32>
    %162 = arith.mulf %152, %161 : vector<8x128xf32>
    %163 = vector.broadcast %145 : vector<1x128xf32> to vector<8x128xf32>
    %164 = arith.mulf %162, %163 : vector<8x128xf32>
    %165 = vector.broadcast %146 : vector<1x128xf32> to vector<8x128xf32>
    %166 = arith.addf %164, %165 : vector<8x128xf32>
    %c0_77 = arith.constant 0 : index
    %c0_78 = arith.constant 0 : index
    %c0_79 = arith.constant 0 : index
    %167 = vector.load %arg18[%c0_77, %c0_78, %c0_79] : memref<1x8x128xf32, #tpu.memory_space<vmem>>, vector<1x8x128xf32>
    %168 = vector.shape_cast %167 : vector<1x8x128xf32> to vector<8x128xf32>
    %169 = vector.shape_cast %166 : vector<8x128xf32> to vector<1x8x128xf32>
    tpu.vector_store %arg18[%c0_77, %c0_78, %c0_79], %169 {strides = array<i32>} : memref<1x8x128xf32, #tpu.memory_space<vmem>>, vector<1x8x128xf32>,
    return
  }
  func.func @transform_0(%arg0: i32) -> (i32, i32, i32) {
    %c0_i32 = arith.constant 0 : i32
    %c0_i32_0 = arith.constant 0 : i32
    %c0_i32_1 = arith.constant 0 : i32
    return %arg0, %c0_i32, %c0_i32_0 : i32, i32, i32
  }
  func.func @transform_1(%arg0: i32) -> (i32, i32) {
    %c0_i32 = arith.constant 0 : i32
    %c0_i32_0 = arith.constant 0 : i32
    %c0_i32_1 = arith.constant 0 : i32
    return %c0_i32, %c0_i32_0 : i32, i32
  }
  func.func @transform_2(%arg0: i32) -> (i32, i32) {
    %c0_i32 = arith.constant 0 : i32
    %c0_i32_0 = arith.constant 0 : i32
    %c0_i32_1 = arith.constant 0 : i32
    return %c0_i32, %c0_i32_0 : i32, i32
  }
  func.func @transform_3(%arg0: i32) -> (i32, i32) {
    %c0_i32 = arith.constant 0 : i32
    %c0_i32_0 = arith.constant 0 : i32
    %c0_i32_1 = arith.constant 0 : i32
    return %c0_i32, %c0_i32_0 : i32, i32
  }
  func.func @transform_4(%arg0: i32) -> (i32, i32) {
    %c0_i32 = arith.constant 0 : i32
    %c0_i32_0 = arith.constant 0 : i32
    %c0_i32_1 = arith.constant 0 : i32
    return %c0_i32, %c0_i32_0 : i32, i32
  }
  func.func @transform_5(%arg0: i32) -> (i32, i32) {
    %c0_i32 = arith.constant 0 : i32
    %c0_i32_0 = arith.constant 0 : i32
    %c0_i32_1 = arith.constant 0 : i32
    return %c0_i32, %c0_i32_0 : i32, i32
  }
  func.func @transform_6(%arg0: i32) -> (i32, i32) {
    %c0_i32 = arith.constant 0 : i32
    %c0_i32_0 = arith.constant 0 : i32
    %c0_i32_1 = arith.constant 0 : i32
    return %c0_i32, %c0_i32_0 : i32, i32
  }
  func.func @transform_7(%arg0: i32) -> (i32, i32) {
    %c0_i32 = arith.constant 0 : i32
    %c0_i32_0 = arith.constant 0 : i32
    %c0_i32_1 = arith.constant 0 : i32
    return %c0_i32, %c0_i32_0 : i32, i32
  }
  func.func @transform_8(%arg0: i32) -> (i32, i32) {
    %c0_i32 = arith.constant 0 : i32
    %c0_i32_0 = arith.constant 0 : i32
    %c0_i32_1 = arith.constant 0 : i32
    return %c0_i32, %c0_i32_0 : i32, i32
  }
  func.func @transform_9(%arg0: i32) -> (i32, i32) {
    %c0_i32 = arith.constant 0 : i32
    %c0_i32_0 = arith.constant 0 : i32
    %c0_i32_1 = arith.constant 0 : i32
    return %c0_i32, %c0_i32_0 : i32, i32
  }
  func.func @transform_10(%arg0: i32) -> (i32, i32) {
    %c0_i32 = arith.constant 0 : i32
    %c0_i32_0 = arith.constant 0 : i32
    %c0_i32_1 = arith.constant 0 : i32
    return %c0_i32, %c0_i32_0 : i32, i32
  }
  func.func @transform_11(%arg0: i32) -> (i32, i32) {
    %c0_i32 = arith.constant 0 : i32
    %c0_i32_0 = arith.constant 0 : i32
    %c0_i32_1 = arith.constant 0 : i32
    return %c0_i32, %c0_i32_0 : i32, i32
  }
  func.func @transform_12(%arg0: i32) -> (i32, i32) {
    %c0_i32 = arith.constant 0 : i32
    %c0_i32_0 = arith.constant 0 : i32
    %c0_i32_1 = arith.constant 0 : i32
    return %c0_i32, %c0_i32_0 : i32, i32
  }
  func.func @transform_13(%arg0: i32) -> (i32, i32) {
    %c0_i32 = arith.constant 0 : i32
    %c0_i32_0 = arith.constant 0 : i32
    %c0_i32_1 = arith.constant 0 : i32
    return %c0_i32, %c0_i32_0 : i32, i32
  }
  func.func @transform_14(%arg0: i32) -> (i32, i32) {
    %c0_i32 = arith.constant 0 : i32
    %c0_i32_0 = arith.constant 0 : i32
    %c0_i32_1 = arith.constant 0 : i32
    return %c0_i32, %c0_i32_0 : i32, i32
  }
  func.func @transform_15(%arg0: i32) -> (i32, i32) {
    %c0_i32 = arith.constant 0 : i32
    %c0_i32_0 = arith.constant 0 : i32
    %c0_i32_1 = arith.constant 0 : i32
    return %c0_i32, %c0_i32_0 : i32, i32
  }
  func.func @transform_16(%arg0: i32) -> (i32, i32) {
    %c0_i32 = arith.constant 0 : i32
    %c0_i32_0 = arith.constant 0 : i32
    %c0_i32_1 = arith.constant 0 : i32
    return %c0_i32, %c0_i32_0 : i32, i32
  }
  func.func @transform_17(%arg0: i32) -> (i32, i32, i32) {
    %c0_i32 = arith.constant 0 : i32
    %c0_i32_0 = arith.constant 0 : i32
    %c0_i32_1 = arith.constant 0 : i32
    return %arg0, %c0_i32, %c0_i32_0 : i32, i32, i32
  }
}

</mosaic_0001>

<bundles_post_ra>
// kernel: tpu_custom_call.1
= control target key start
LH: loop header
LB: loop body
LE: loop exit
PB: predicated region body
PF: predicated region fallthrough
CT: control target
= control target key end

     0   :  { %s3658_s0 = inlined_call_operand.hbm [shape: f32[2,8,128], index: 0, kind: input, shape index: {}]   ;;  %s3659_s1 = inlined_call_operand.hbm [shape: f32[128,128], index: 1, kind: input, shape index: {}]   ;;  %s3660_s2 = inlined_call_operand.vmem [shape: f32[1,128], index: 2, kind: input, shape index: {}]   ;;  %s3661_s3 = inlined_call_operand.hbm [shape: f32[128,128], index: 3, kind: input, shape index: {}]   ;;  %s3662_s4 = inlined_call_operand.vmem [shape: f32[1,128], index: 4, kind: input, shape index: {}]   ;;  %s3663_s5 = inlined_call_operand.hbm [shape: f32[128,128], index: 5, kind: input, shape index: {}]   ;;  %s3664_s6 = inlined_call_operand.vmem [shape: f32[1,128], index: 6, kind: input, shape index: {}]   ;;  %s3665_s7 = inlined_call_operand.hbm [shape: f32[128,128], index: 7, kind: input, shape index: {}]   ;;  %s3666_s8 = inlined_call_operand.vmem [shape: f32[1,128], index: 8, kind: input, shape index: {}]   ;;  %s3667_s9 = inlined_call_operand.vmem [shape: f32[1,128], index: 9, kind: input, shape index: {}]   ;;  %s3668_s10 = inlined_call_operand.vmem [shape: f32[1,128], index: 10, kind: input, shape index: {}]   ;;  %s3669_s11 = inlined_call_operand.hbm [shape: f32[128,256], index: 11, kind: input, shape index: {}]   ;;  %s3670_s12 = inlined_call_operand.vmem [shape: f32[1,256], index: 12, kind: input, shape index: {}]   ;;  %s3671_s13 = inlined_call_operand.hbm [shape: f32[256,128], index: 13, kind: input, shape index: {}]   ;;  %s3672_s14 = inlined_call_operand.vmem [shape: f32[1,128], index: 14, kind: input, shape index: {}]   ;;  %s3673_s15 = inlined_call_operand.vmem [shape: f32[1,128], index: 15, kind: input, shape index: {}]   ;;  %s3674_s16 = inlined_call_operand.vmem [shape: f32[1,128], index: 16, kind: input, shape index: {}]   ;;  %s3675_s17 = inlined_call_operand.hbm [shape: f32[2,8,128], index: 17, kind: output, shape index: {}]  }
   0x1   :  { %3689 = sst [smem:[#allocation23_spill]] %s3658_s0 }
   0x2   :  { %3690 = sst [smem:[#allocation24_spill]] %s3659_s1 }
   0x3   :  { %3691 = sst [smem:[#allocation25_spill]] %s3661_s3 }
   0x4   :  { %3692 = sst [smem:[#allocation26_spill]] %s3663_s5 }
   0x5   :  { %3693 = sst [smem:[#allocation27_spill]] %s3665_s7 }
   0x6   :  { %3694 = sst [smem:[#allocation28_spill]] %s3669_s11 }
   0x7   :  { %3695 = sst [smem:[#allocation29_spill]] %s3671_s13 }
   0x8   :  { %3696 = sst [smem:[#allocation30_spill]] %s3673_s15 }
   0x9   :  { %3697 = sst [smem:[#allocation31_spill]] %s3674_s16 }
   0xa   :  { %3698 = sst [smem:[#allocation32_spill]] %s3675_s17 }
   0xb   :  { %22 = vsyncpa [#allocation3], 0 }
   0xc   :  { %24 = vsyncpa [#allocation3 + $0x1], 0 }
   0xd   :  { %25 = vsyncpa [#allocation6], 0 }
   0xe   :  { %26 = vsyncpa [#allocation9], 0 }
   0xf   :  { %27 = vsyncpa [#allocation12], 0 }
  0x10   :  { %28 = vsyncpa [#allocation4], 0 }
  0x11   :  { %30 = vsyncpa [#allocation4 + $0x1], 0  ;;  %s3221_s24 = smov 0   ;;  %s3223_s25 = smov 0  }
  0x12   :  { %s3225_s26 = smov 0   ;;  %s3227_s27 = smov 0  }
  0x13 LB: > { %3699 = sst [smem:[#allocation20_spill]] %s3108_s26  ;;  %s3114_s28 = smov [#allocation5]   ;;  %s3112_s27 = sphi %s3227_s27, %s3733_s27   ;;  %s3108_s26 = sphi %s3225_s26, %s3735_s26   ;;  %s3104_s25 = sphi %s3223_s25, %s3737_s25   ;;  %s3100_s24 = sphi %s3221_s24, %s3736_s24  }
  0x14   : > { %s441_s29 = sshll.u32 %s3114_s28, 4  ;;  %s3242_s0 = sadd.s32 4294967295, %s3112_s27   ;;  %s442_s29 = int_to_ptr.vmem [resolvable:$true] %s441_s29 }
  0x15   : > { %p2353_p0 = scmp.ge.s32.totalorder %s3112_s27, 1  ;;  %p3682_p1 = scmp.eq.s32.totalorder %s3242_s0, 0 }
  0x16   : > { %p429_p2 = scmp.lt.s32.totalorder %s3112_s27, 3  ;;  %s3115_s18 = smov [#allocation8]  }
  0x17   : > { %s473_s19 = sshll.u32 %s3115_s18, 4  ;;  %s3116_s20 = smov [#allocation11]   ;;  %s3260_s19 = int_to_ptr.vmem [resolvable:$true] %s473_s19 }
  0x18   : > { %p3247_p3 = pnand %p2353_p0, %p429_p2  ;;  %s511_s21 = sshll.u32 %s3116_s20, 4  ;;  %s3262_s21 = int_to_ptr.vmem [resolvable:$true] %s511_s21 }
  0x19   : > { %s2863_s23 = scalar_lea.vmem %s442_s29, 2048  ;;  %p2871_p11 = scmp.lt.s32.totalorder %s442_s29, %s442_s29 }
  0x1a   : > { %s3700_s30 = scalar_select %p3247_p3, 1, 0 }
  0x1b   : > { %p2740_p5 = pneg %p3247_p3  ;;  %p2864_p8 = scmp.ne.s32.totalorder %s442_s29, %s2863_s23 }
  0x1c   : > { %p2872_p12 = scmp.lt.s32.totalorder %s2863_s23, %s2863_s23 }
  0x1d   : > { %p3256_p6 = pnand %p2740_p5, %p3682_p1 }
  0x1e   : > { %p2873_p13 = por %p2872_p12, %p2871_p11 }
  0x1f   : > { %p3266_p7 = pneg %p3256_p6 }
  0x21   : > { %p2866_p9 = pnand %p2864_p8, %p3266_p7 }
  0x23   : > { %p2867_p10 = pneg %p2866_p9 }
  0x25   : > { %p2874_p0 = pnand %p2873_p13, %p2867_p10 }
  0x27   : > { %2877 = shalt.err (!%p2874_p0)
}
  0x28   : > { %s3678_s28 = smov 128   ;;  %s3680_s18 = smov 8  }
  0x29   : > { %s3703_s16 = sld [smem:[#allocation24_spill]]  ;;  %s2889_s15 = scalar_lea.vmem %s3260_s19, 2048 }
  0x2a   : > { %p2890_p2 = scmp.ne.s32.totalorder %s3260_s19, %s2889_s15  ;;  %p2897_p9 = scmp.lt.s32.totalorder %s3260_s19, %s3260_s19 }
  0x2b   : > { %p2898_p10 = scmp.lt.s32.totalorder %s2889_s15, %s2889_s15 }
  0x2c   : > { %p2892_p5 = pnand %p2890_p2, %p3266_p7 }
  0x2d   : > { %p2899_p11 = por %p2898_p10, %p2897_p9 }
  0x2e   : > { %p2893_p8 = pneg %p2892_p5 }
  0x2f   : > { %2743 = dma.hbm_to_vmem [thread:$0]  (!%p3256_p6), %s3703_s16, 2048, %s442_s29, [#allocation6], %s3678_s28, %s3678_s28, %s3680_s18  }
  0x30   : > { %p2900_p12 = pnand %p2899_p11, %p2893_p8 }
  0x32   : > { %2903 = shalt.err (!%p2900_p12)
}
  0x33   : > { %s3704_s5 = sld [smem:[#allocation26_spill]]  ;;  %s2915_s16 = scalar_lea.vmem %s3262_s21, 4096 }
  0x34   : > { %p2916_p13 = scmp.ne.s32.totalorder %s3262_s21, %s2915_s16  ;;  %p2923_p5 = scmp.lt.s32.totalorder %s3262_s21, %s3262_s21 }
  0x35   : > { %p2924_p8 = scmp.lt.s32.totalorder %s2915_s16, %s2915_s16 }
  0x36   : > { %p2918_p0 = pnand %p2916_p13, %p3266_p7 }
  0x37   : > { %p2925_p9 = por %p2924_p8, %p2923_p5 }
  0x38   : > { %p2919_p2 = pneg %p2918_p0 }
  0x39   : > { %2749 = dma.hbm_to_vmem [thread:$0]  (!%p3256_p6), %s3704_s5, 2048, %s3260_s19, [#allocation9], %s3678_s28, %s3678_s28, %s3680_s18  }
  0x3a   : > { %p2926_p10 = pnand %p2925_p9, %p2919_p2 }
  0x3c   : > { %2929 = shalt.err (!%p2926_p10)
}
  0x3d   : > { %s3119_s15 = smov 256   ;;  %s3120_s29 = smov 16  }
  0x3e   : > { %s3705_s11 = sld [smem:[#allocation28_spill]]  ;;  %s3121_s19 = smov [#allocation7]  }
  0x3f   : > { %s457_s17 = sshll.u32 %s3121_s19, 4  ;;  %s3122_s28 = smov [#allocation10]   ;;  %s458_s17 = int_to_ptr.vmem [resolvable:$true] %s457_s17 }
  0x40   : > { %s489_s18 = sshll.u32 %s3122_s28, 4  ;;  %s2941_s5 = scalar_lea.vmem %s458_s17, 2048  ;;  %s490_s18 = int_to_ptr.vmem [resolvable:$true] %s489_s18 }
  0x41   : > { %p2942_p11 = scmp.ne.s32.totalorder %s458_s17, %s2941_s5  ;;  %p2949_p0 = scmp.lt.s32.totalorder %s458_s17, %s458_s17 }
  0x42   : > { %p2950_p2 = scmp.lt.s32.totalorder %s2941_s5, %s2941_s5 }
  0x43   : > { %p2944_p12 = pnand %p2942_p11, %p3266_p7 }
  0x44   : > { %2755 = dma.hbm_to_vmem [thread:$0]  (!%p3256_p6), %s3705_s11, 4096, %s3262_s21, [#allocation12], %s3119_s15, %s3119_s15, %s3120_s29  }
  0x45   : > { %p2945_p13 = pneg %p2944_p12  ;;  %p2951_p5 = por %p2950_p2, %p2949_p0 }
  0x47   : > { %p2952_p8 = pnand %p2951_p5, %p2945_p13 }
  0x49   : > { %2955 = shalt.err (!%p2952_p8)
}
  0x4a   : > { %s3706_s16 = smov 8   ;;  %s3707_s20 = smov 128  }
  0x4b   : > { %s3708_s3 = sld [smem:[#allocation25_spill]]  ;;  %s2967_s28 = scalar_lea.vmem %s490_s18, 2048 }
  0x4c   : > { %p2968_p9 = scmp.ne.s32.totalorder %s490_s18, %s2967_s28  ;;  %p2975_p12 = scmp.lt.s32.totalorder %s490_s18, %s490_s18 }
  0x4d   : > { %p2976_p0 = scmp.lt.s32.totalorder %s2967_s28, %s2967_s28 }
  0x4e   : > { %p2970_p10 = pnand %p2968_p9, %p3266_p7 }
  0x4f   : > { %p2977_p13 = por %p2976_p0, %p2975_p12 }
  0x50   : > { %p2971_p11 = pneg %p2970_p10 }
  0x51   : > { %2746 = dma.hbm_to_vmem [thread:$0]  (!%p3256_p6), %s3708_s3, 2048, %s458_s17, [#allocation6], %s3707_s20, %s3707_s20, %s3706_s16  }
  0x52   : > { %p2978_p2 = pnand %p2977_p13, %p2971_p11 }
  0x54   : > { %2981 = shalt.err (!%p2978_p2)
}
  0x55   : > { %s3709_s7 = sld [smem:[#allocation27_spill]]  ;;  %s3123_s23 = smov [#allocation13]  }
  0x56   : > { %s527_s19 = sshll.u32 %s3123_s23, 4  ;;  %s528_s19 = int_to_ptr.vmem [resolvable:$true] %s527_s19 }
  0x57   : > { %s2993_s17 = scalar_lea.vmem %s528_s19, 4096  ;;  %p3001_p10 = scmp.lt.s32.totalorder %s528_s19, %s528_s19 }
  0x58   : > { %p2994_p5 = scmp.ne.s32.totalorder %s528_s19, %s2993_s17  ;;  %p3002_p11 = scmp.lt.s32.totalorder %s2993_s17, %s2993_s17 }
  0x5a   : > { %p2996_p8 = pnand %p2994_p5, %p3266_p7  ;;  %p3003_p12 = por %p3002_p11, %p3001_p10 }
  0x5b   : > { %2752 = dma.hbm_to_vmem [thread:$0]  (!%p3256_p6), %s3709_s7, 2048, %s490_s18, [#allocation9], %s3707_s20, %s3707_s20, %s3706_s16  }
  0x5c   : > { %p2997_p9 = pneg %p2996_p8 }
  0x5e   : > { %p3004_p0 = pnand %p3003_p12, %p2997_p9 }
  0x60   : > { %3007 = shalt.err (!%p3004_p0)
}
  0x61   : > { %s3710_s13 = sld [smem:[#allocation29_spill]]  ;;  %s2352_s1 = sadd.s32 4294967294, %s3112_s27  }
  0x62   : > { %s3339_s22 = sadd.s32 1, %s3112_s27   ;;  %s43_s28 = sadd.s32 1, %s3108_s26 }
  0x63   : > { %3711 = sst [smem:[#allocation21_spill]] %s3339_s22  ;;  %s40_s15 = ssub.s32 %s3112_s27, %s3339_s22 }
  0x64   : > { %p41_p7 = scmp.eq.s32.totalorder %s40_s15, 0  ;;  %p50_p13 = scmp.ne.s32.totalorder %s3108_s26, %s3104_s25 }
  0x65   : > { %p51_p2 = scmp.eq.s32.totalorder %s3112_s27, 0  ;;  %p56_p5 = scmp.ne.s32.totalorder %s3104_s25, %s3100_s24 }
  0x66   : > { %s3350_s5 = scalar_select %p41_p7, %s3108_s26, %s43_s28  }
  0x67   : > { %2758 = dma.hbm_to_vmem [thread:$0]  (!%p3256_p6), %s3710_s13, 4096, %s528_s19, [#allocation12], %s3707_s20, %s3707_s20, %s3706_s16  }
  0x68   : > { %3712 = sst [smem:[#allocation22_spill]] %s3350_s5  ;;  %p3352_p8 = por %p51_p2, %p50_p13 }
  0x69   : > { %p3358_p6 = por %p3682_p1, %p56_p5  ;;  %p416_p9 = scmp.eq.s32.totalorder %s3242_s0, 1 }
  0x6a   : > { %p422_p10 = scmp.eq.s32.totalorder %s2352_s1, 1  ;;  %p2773_p11 = scmp.lt.s32.totalorder %s3112_s27, 2 }
  0x6b   : > { %s3714_s16 = scalar_select %p3358_p6, 1, 0 }
  0x6c   : > { %s550_s20 = sand.u32 1, %s3108_s26   ;;  %p3365_p12 = por %p416_p9, %p50_p13 }
  0x6d   : > { %p3369_p0 = por %p422_p10, %p56_p5  ;;  %s2361_s17 = sshll.u32 %s550_s20, 3 }
  0x6e   : > { %s3715_s23 = scalar_select %p3365_p12, 1, 0 }
  0x6f   : > { %s3716_s19 = scalar_select %p3369_p0, 1, 0 }
  0x70   : > { %s2362_s21 = sshll.u32 %s3112_s27, 7  ;;  %s3717_s28 = sld [smem:[#allocation23_spill]] }
  0x71   : > { %s554_s1 = scalar_lea.vmem [#allocation2], %s2361_s17  ;;  %p3381_p7 = pnand %p2773_p11, %p3352_p8 }
  0x72   : > { %s561_s7 = sshll.u32 %s554_s1, 4  ;;  %s551_s13 = scalar_lea.sflag [#allocation3], %s550_s20  ;;  %s562_s7 = int_to_ptr.vmem [resolvable:$true] %s561_s7 }
  0x73   : > { %p3010_p2 = pneg %p3381_p7 }
  0x76   : > { %s3377_s3 = scalar_lea.hbm %s3717_s28, %s2362_s21  ;;  %s3013_s15 = scalar_lea.hbm %s3717_s28, 256 }
  0x77   : > { %s3008_s5 = scalar_lea.hbm %s3377_s3, 128  ;;  %p3014_p10 = scmp.lt.s32.totalorder %s3377_s3, %s3717_s28 }
  0x78   : > { %p3009_p13 = scmp.ne.s32.totalorder %s3377_s3, %s3008_s5  ;;  %p3015_p8 = scmp.lt.s32.totalorder %s3013_s15, %s3008_s5 }
  0x7a   : > { %p3011_p5 = pnand %p3010_p2, %p3009_p13  ;;  %p3016_p11 = por %p3015_p8, %p3014_p10 }
  0x7c   : > { %p3012_p9 = pneg %p3011_p5 }
  0x7e   : > { %p3017_p4 = pnand %p3016_p11, %p3012_p9 }
  0x80   : > { %3020 = shalt.err (!%p3017_p4)
}
  0x81   : > { %s3021_s29 = scalar_lea.vmem %s562_s7, 128  ;;  %s3124_s20 = smov [#allocation2]  }
  0x82   : > { %p3022_p1 = scmp.ne.s32.totalorder %s562_s7, %s3021_s29  ;;  %s3026_s26 = sshll.u32 %s3124_s20, 4  ;;  %s3027_s26 = int_to_ptr.vmem [resolvable:$false] %s3026_s26 }
  0x83   : > { %s3028_s22 = scalar_lea.vmem %s3027_s26, 256  ;;  %p3029_p13 = scmp.lt.s32.totalorder %s562_s7, %s3027_s26 }
  0x84   : > { %p3024_p0 = pnand %p3022_p1, %p3010_p2  ;;  %p3030_p5 = scmp.lt.s32.totalorder %s3028_s22, %s3021_s29 }
  0x86   : > { %p3025_p12 = pneg %p3024_p0  ;;  %p3031_p6 = por %p3030_p5, %p3029_p13 }
  0x88   : > { %p3032_p3 = pnand %p3031_p6, %p3025_p12 }
  0x8a   : > { %3035 = shalt.err (!%p3032_p3)
}
  0x8b   : > { %2762 = dma.hbm_to_vmem [thread:$0]  (!%p3381_p7), %s3377_s3, 128, %s562_s7, %s551_s13  }
  0x8c   : > { %p3719_p9 = scmp.ne.s32.totalorder %s3700_s30, 0 }
  0x8d   : > { %s3402_s5 = sand.u32 (!%p3719_p9), 1, %s3104_s25   ;;  %p3720_p1 = scmp.ne.s32.totalorder (!%p3719_p9), %s3714_s16, 0 }
  0x8e   : > { %570 = sbr.rel (%p3719_p9) target bundleno = 4074 (0xfea), region = 88  ;;  %s2364_s21 = sshll.u32 (!%p3719_p9), %s3402_s5, 3 }
  0x8f   : > { %s573_s26 = scalar_lea.sflag (!%p3719_p9), [#allocation3], %s3402_s5  ;;  %s3408_s22 = scalar_lea.vmem (!%p3719_p9), [#allocation2], %s2364_s21 }
  0x93   : > { %3079 = dma.done.wait (%p3720_p1), %s573_s26, 128  }
  0x94   : > { %3081 = vsyncadd (%p3720_p1), %s573_s26, 4294967168  ;;  %p3721_p3 = scmp.eq.s32.totalorder %s3242_s0, 0 }
  0x96   : > { %3083 = dma.done.wait (%p3721_p3), [#allocation6], 4096   ;;  %p3722_p4 = pmov %p3721_p3 }
  0x97   : > { %p3723_p6 = pmov %p3721_p3 }
  0x98   : > { %3085 = vsyncadd (%p3722_p4), [#allocation6], 4294963200 }
  0x99   : > { %3087 = dma.done.wait (%p3723_p6), [#allocation9], 4096   ;;  %p3724_p12 = pmov %p3721_p3 }
  0x9a   : > { %p3725_p0 = pmov %p3721_p3 }
  0x9b   : > { %3089 = vsyncadd (%p3724_p12), [#allocation9], 4294963200 }
  0x9c   : > { %3091 = dma.done.wait (%p3725_p0), [#allocation12], 8192   ;;  %p3726_p7 = pmov %p3725_p0 }
  0x9d   : > { %v3125_v0 = vmov 0.0   ;;  %vm3126_vm0 = vmmov 0   ;;  %v760_v1 = vld [vmem:[#allocation7 + $0x78] sm:$0xff]  ;;  %v759_v3 = vld [vmem:[#allocation7 + $0x70] sm:$0xff]  ;;  %v758_v5 = vld [vmem:[#allocation7 + $0x68] sm:$0xff]  ;;  %vm947_vm1 = vcmask 261120  }
  0x9e   : > { %3093 = vsyncadd (%p3726_p7), [#allocation12], 4294959104  ;;  %2558 = vmatprep.subr.mxu1 %v3125_v0  ;;  %2523 = vmatprep.subr.mxu0 %v3125_v0  ;;  %v667_v2 = vld [vmem:[#allocation5 + $0x78] sm:$0xff]  ;;  %v666_v4 = vld [vmem:[#allocation5 + $0x70] sm:$0xff]  ;;  %s3127_s30 = smov 96   ;;  %vm1025_vm2 = vcmask 64512  }
  0x9f   : > { %2590 = vmatprep.mubr.msk.f32.mxu1 %vm3126_vm0, %v3125_v0  ;;  %2555 = vmatprep.mubr.msk.f32.mxu0 %vm3126_vm0, %v3125_v0  ;;  %v665_v6 = vld [vmem:[#allocation5 + $0x68] sm:$0xff]  ;;  %v757_v7 = vld [vmem:[#allocation7 + $0x60] sm:$0xff]  ;;  %v756_v9 = vld [vmem:[#allocation7 + $0x58] sm:$0xff]  ;;  %s3128_s15 = smov 64   ;;  %s3129_s17 = smov 32  }
  0xa0   : > { %2559 = vmatpush3.msra.mxu1 %v760_v1  ;;  %2524 = vmatpush3.msra.mxu0 %v667_v2  ;;  %v664_v8 = vld [vmem:[#allocation5 + $0x60] sm:$0xff]  ;;  %v663_v10 = vld [vmem:[#allocation5 + $0x58] sm:$0xff]  ;;  %v755_v11 = vld [vmem:[#allocation7 + $0x50] sm:$0xff]  ;;  %s3728_s29 = sld [smem:[#allocation31_spill]]  ;;  %s2398_s20 = sshll.u32 %s3242_s0, 7 }
  0xa1   : > { %2560 = vmatprep.subr.mxu1 %v3125_v0  ;;  %2525 = vmatprep.subr.mxu0 %v3125_v0  ;;  %v662_v12 = vld [vmem:[#allocation5 + $0x50] sm:$0xff]  ;;  %v754_v13 = vld [vmem:[#allocation7 + $0x48] sm:$0xff]  ;;  %v753_v15 = vld [vmem:[#allocation7 + $0x40] sm:$0xff]  ;;  %s650_s26 = scalar_lea.vmem [#allocation14], %s2364_s21  ;;  %s3729_s11 = sld [smem:[#allocation32_spill]] }
  0xa2   : > { %2561 = vmatpush3.msra.mxu1 %v759_v3  ;;  %2526 = vmatpush3.msra.mxu0 %v666_v4  ;;  %v661_v14 = vld [vmem:[#allocation5 + $0x48] sm:$0xff]  ;;  %v660_v16 = vld [vmem:[#allocation5 + $0x40] sm:$0xff]  ;;  %v752_v17 = vld [vmem:[#allocation7 + $0x38] sm:$0xff]  ;;  %p3730_p10 = scmp.ne.s32.totalorder %s3715_s23, 0  ;;  %s3130_s18 = smov [#allocation14]  }
  0xa3   : > { %2562 = vmatprep.subr.mxu1 %v3125_v0  ;;  %2527 = vmatprep.subr.mxu0 %v3125_v0  ;;  %v659_v18 = vld [vmem:[#allocation5 + $0x38] sm:$0xff]  ;;  %v751_v19 = vld [vmem:[#allocation7 + $0x30] sm:$0xff]  ;;  %v750_v21 = vld [vmem:[#allocation7 + $0x28] sm:$0xff] }
  0xa4   : > { %2563 = vmatpush3.msra.mxu1 %v758_v5  ;;  %2528 = vmatpush3.msra.mxu0 %v665_v6  ;;  %v658_v20 = vld [vmem:[#allocation5 + $0x30] sm:$0xff]  ;;  %v657_v22 = vld [vmem:[#allocation5 + $0x28] sm:$0xff]  ;;  %v749_v23 = vld [vmem:[#allocation7 + $0x20] sm:$0xff] }
  0xa5   : > { %2564 = vmatprep.subr.mxu1 %v3125_v0  ;;  %2529 = vmatprep.subr.mxu0 %v3125_v0  ;;  %v656_v24 = vld [vmem:[#allocation5 + $0x20] sm:$0xff]  ;;  %v748_v25 = vld [vmem:[#allocation7 + $0x18] sm:$0xff]  ;;  %v747_v27 = vld [vmem:[#allocation7 + $0x10] sm:$0xff] }
  0xa6   : > { %2565 = vmatpush3.msra.mxu1 %v757_v7  ;;  %2530 = vmatpush3.msra.mxu0 %v664_v8  ;;  %v655_v26 = vld [vmem:[#allocation5 + $0x18] sm:$0xff]  ;;  %v654_v28 = vld [vmem:[#allocation5 + $0x10] sm:$0xff]  ;;  %v746_v29 = vld [vmem:[#allocation7 + $0x8] sm:$0xff] }
  0xa7   : > { %2566 = vmatprep.subr.mxu1 %v3125_v0  ;;  %2531 = vmatprep.subr.mxu0 %v3125_v0  ;;  %v653_v30 = vld [vmem:[#allocation5 + $0x8] sm:$0xff]  ;;  %v745_v31 = vld [vmem:[#allocation7] sm:$0xff]  ;;  %v3461_v33 = vld [vmem:[%s3408_s22] sm:$0xff]  ;;  %s2225_s22 = sshll.u32 %s650_s26, 4  ;;  %s2223_s13 = scalar_lea.hbm %s3729_s11, %s2398_s20  ;;  %s2226_s22 = int_to_ptr.vmem [resolvable:$true] %s2225_s22 }
  0xa8   : > { %2567 = vmatpush3.msra.mxu1 %v756_v9  ;;  %2532 = vmatpush3.msra.mxu0 %v663_v10  ;;  %v652_v32 = vld [vmem:[#allocation5] sm:$0xff]  ;;  %v2373_v34 = vld [vmem:[%s3662_s4] ss:$0 sm:$0xff]  ;;  %v853_v42 = vld [vmem:[#allocation8 + $0x78] sm:$0xff]  ;;  %s3036_s16 = scalar_lea.vmem %s2226_s22, 128 }
  0xa9   : > { %2568 = vmatprep.subr.mxu1 %v3125_v0  ;;  %2533 = vmatprep.subr.mxu0 %v3125_v0  ;;  %v2372_v35 = vld [vmem:[%s3660_s2] ss:$0 sm:$0xff]  ;;  %v851_v44 = vld [vmem:[#allocation8 + $0x68] sm:$0xff]  ;;  %v850_v45 = vld [vmem:[#allocation8 + $0x60] sm:$0xff]  ;;  %p3037_p2 = scmp.ne.s32.totalorder %s2226_s22, %s3036_s16 }
  0xaa   : > { %2569 = vmatpush3.msra.mxu1 %v755_v11  ;;  %2534 = vmatpush3.msra.mxu0 %v662_v12  ;;  %v852_v43 = vld [vmem:[#allocation8 + $0x70] sm:$0xff]  ;;  %v849_v46 = vld [vmem:[#allocation8 + $0x58] sm:$0xff]  ;;  %v847_v48 = vld [vmem:[#allocation8 + $0x48] sm:$0xff] }
  0xab   : > { %2570 = vmatprep.subr.mxu1 %v3125_v0  ;;  %2535 = vmatprep.subr.mxu0 %v3125_v0  ;;  %v848_v47 = vld [vmem:[#allocation8 + $0x50] sm:$0xff]  ;;  %v846_v49 = vld [vmem:[#allocation8 + $0x40] sm:$0xff]  ;;  %v845_v50 = vld [vmem:[#allocation8 + $0x38] sm:$0xff]  ;;  %p3038_p8 = pnand %p3037_p2, %p3730_p10 }
  0xac   : > { %2571 = vmatpush3.msra.mxu1 %v754_v13  ;;  %2536 = vmatpush3.msra.mxu0 %v661_v14  ;;  %v844_v51 = vld [vmem:[#allocation8 + $0x30] sm:$0xff]  ;;  %v843_v52 = vld [vmem:[#allocation8 + $0x28] sm:$0xff]  ;;  %v842_v53 = vld [vmem:[#allocation8 + $0x20] sm:$0xff] }
  0xad   : > { %2572 = vmatprep.subr.mxu1 %v3125_v0  ;;  %2537 = vmatprep.subr.mxu0 %v3125_v0  ;;  %v841_v54 = vld [vmem:[#allocation8 + $0x18] sm:$0xff]  ;;  %v840_v55 = vld [vmem:[#allocation8 + $0x10] sm:$0xff]  ;;  %v839_v56 = vld [vmem:[#allocation8 + $0x8] sm:$0xff]  ;;  %p3039_p11 = pneg %p3038_p8 }
  0xae   : > { %2573 = vmatpush3.msra.mxu1 %v753_v15  ;;  %2538 = vmatpush3.msra.mxu0 %v660_v16  ;;  %v838_v57 = vld [vmem:[#allocation8] sm:$0xff]  ;;  %v2374_v4 = vld [vmem:[%s3664_s6] ss:$0 sm:$0xff] }
  0xaf   : > { %2574 = vmatprep.subr.mxu1 %v3125_v0  ;;  %2539 = vmatprep.subr.mxu0 %v3125_v0 }
  0xb0   : > { %2575 = vmatpush3.msra.mxu1 %v752_v17  ;;  %2540 = vmatpush3.msra.mxu0 %v659_v18 }
  0xb1   : > { %2576 = vmatprep.subr.mxu1 %v3125_v0  ;;  %2541 = vmatprep.subr.mxu0 %v3125_v0 }
  0xb2   : > { %2577 = vmatpush3.msra.mxu1 %v751_v19  ;;  %2542 = vmatpush3.msra.mxu0 %v658_v20 }
  0xb3   : > { %2578 = vmatprep.subr.mxu1 %v3125_v0  ;;  %2543 = vmatprep.subr.mxu0 %v3125_v0 }
  0xb4   : > { %2579 = vmatpush3.msra.mxu1 %v750_v21  ;;  %2544 = vmatpush3.msra.mxu0 %v657_v22 }
  0xb5   : > { %2580 = vmatprep.subr.mxu1 %v3125_v0  ;;  %2545 = vmatprep.subr.mxu0 %v3125_v0 }
  0xb6   : > { %2581 = vmatpush3.msra.mxu1 %v749_v23  ;;  %2546 = vmatpush3.msra.mxu0 %v656_v24 }
  0xb7   : > { %2582 = vmatprep.subr.mxu1 %v3125_v0  ;;  %2547 = vmatprep.subr.mxu0 %v3125_v0 }
  0xb8   : > { %2583 = vmatpush3.msra.mxu1 %v748_v25  ;;  %2548 = vmatpush3.msra.mxu0 %v655_v26 }
  0xb9   : > { %2584 = vmatprep.subr.mxu1 %v3125_v0  ;;  %2549 = vmatprep.subr.mxu0 %v3125_v0 }
  0xba   : > { %2585 = vmatpush3.msra.mxu1 %v747_v27  ;;  %2550 = vmatpush3.msra.mxu0 %v654_v28  ;;  %v938_v28 = vld [vmem:[#allocation10 + $0x38] sm:$0xff] }
  0xbb   : > { %2586 = vmatprep.subr.mxu1 %v3125_v0  ;;  %2551 = vmatprep.subr.mxu0 %v3125_v0 }
  0xbc   : > { %2587 = vmatpush3.msra.mxu1 %v746_v29  ;;  %2552 = vmatpush3.msra.mxu0 %v653_v30  ;;  %v937_v29 = vld [vmem:[#allocation10 + $0x30] sm:$0xff]  ;;  %v936_v30 = vld [vmem:[#allocation10 + $0x28] sm:$0xff] }
  0xbd   : > { %2588 = vmatprep.subr.mxu1 %v3125_v0  ;;  %2553 = vmatprep.subr.mxu0 %v3125_v0 }
  0xbe   : > { %2589 = vmatpush3.msra.mxu1 %v745_v31  ;;  %2554 = vmatpush3.msra.mxu0 %v652_v32  ;;  %v935_v31 = vld [vmem:[#allocation10 + $0x20] sm:$0xff]  ;;  %v934_v32 = vld [vmem:[#allocation10 + $0x18] sm:$0xff] }
  0xbf   : > { %2591 = vmatmul.mubr.f32.vlgmr.msra.gmra.mxu1 %v3461_v33  ;;  %2556 = vmatmul.mubr.f32.vlgmr.msra.gmra.mxu0 %v3461_v33 }
  0xc0   : > { %2628 = vmatprep.subr.mxu1 %v3125_v0  ;;  %2630 = vmatprep.mubr.msk.f32.mxu1 %vm3126_vm0, %v3125_v0 }
  0xc1   : > { %2593 = vmatprep.subr.mxu0 %v3125_v0  ;;  %2625 = vmatprep.mubr.msk.f32.mxu0 %vm3126_vm0, %v3125_v0 }
  0xc2   : > { %2594 = vmatpush3.msra.mxu0 %v853_v42 }
  0xc3   : > { %2595 = vmatprep.subr.mxu0 %v3125_v0 }
  0xc4   : > { %2596 = vmatpush3.msra.mxu0 %v852_v43 }
  0xc5   : > { %2597 = vmatprep.subr.mxu0 %v3125_v0 }
  0xc6   : > { %2598 = vmatpush3.msra.mxu0 %v851_v44 }
  0xc7   : > { %2599 = vmatprep.subr.mxu0 %v3125_v0 }
  0xc8   : > { %2600 = vmatpush3.msra.mxu0 %v850_v45 }
  0xc9   : > { %2601 = vmatprep.subr.mxu0 %v3125_v0 }
  0xca   : > { %2602 = vmatpush3.msra.mxu0 %v849_v46 }
  0xcb   : > { %2603 = vmatprep.subr.mxu0 %v3125_v0 }
  0xcc   : > { %2604 = vmatpush3.msra.mxu0 %v848_v47 }
  0xcd   : > { %2605 = vmatprep.subr.mxu0 %v3125_v0 }
  0xce   : > { %2606 = vmatpush3.msra.mxu0 %v847_v48 }
  0xcf   : > { %2607 = vmatprep.subr.mxu0 %v3125_v0 }
  0xd0   : > { %2608 = vmatpush3.msra.mxu0 %v846_v49 }
  0xd1   : > { %2609 = vmatprep.subr.mxu0 %v3125_v0 }
  0xd2   : > { %2610 = vmatpush3.msra.mxu0 %v845_v50 }
  0xd3   : > { %2611 = vmatprep.subr.mxu0 %v3125_v0 }
  0xd4   : > { %2612 = vmatpush3.msra.mxu0 %v844_v51 }
  0xd5   : > { %2613 = vmatprep.subr.mxu0 %v3125_v0 }
  0xd6   : > { %2614 = vmatpush3.msra.mxu0 %v843_v52 }
  0xd7   : > { %2615 = vmatprep.subr.mxu0 %v3125_v0 }
  0xd8   : > { %2616 = vmatpush3.msra.mxu0 %v842_v53 }
  0xd9   : > { %2617 = vmatprep.subr.mxu0 %v3125_v0 }
  0xda   : > { %2618 = vmatpush3.msra.mxu0 %v841_v54 }
  0xdb   : > { %2619 = vmatprep.subr.mxu0 %v3125_v0 }
  0xdc   : > { %2620 = vmatpush3.msra.mxu0 %v840_v55 }
  0xdd   : > { %2621 = vmatprep.subr.mxu0 %v3125_v0 }
  0xde   : > { %2622 = vmatpush3.msra.mxu0 %v839_v56 }
  0xdf   : > { %2623 = vmatprep.subr.mxu0 %v3125_v0 }
  0xe0   : > { %2624 = vmatpush3.msra.mxu0 %v838_v57  ;;  %v942_v57 = vld [vmem:[#allocation10 + $0x58] sm:$0xff] }
  0xe1   : > { %2626 = vmatmul.mubr.f32.vlgmr.msra.gmra.mxu0 %v3461_v33  ;;  %2680 = vmatprep.subr.mxu0 %v3125_v0 }
  0xe2   : > { %2688 = vmatprep.mubr.msk.f32.mxu0 %vm3126_vm0, %v3125_v0  ;;  %2681 = vmatpush3.msra.mxu0 %v942_v57  ;;  %v1950_v57 = vld [vmem:[#allocation11 + $0x50] sm:$0xff] }
  0xe3   : > { %2682 = vmatprep.subr.mxu0 %v3125_v0 }
 0x17f   : > { %v834_v36 = vpop.f32.mrf.mxu1  ;;  %v741_v37 = vpop.f32.mrf.mxu0 }
 0x180   : > { %v3479_v38 = vadd.f32 %v2373_v34, %v834_v36  ;;  %v3481_v39 = vadd.f32 %v2372_v35, %v741_v37  ;;  %v933_v35 = vld [vmem:[#allocation10 + $0x10] sm:$0xff]  ;;  %v932_v37 = vld [vmem:[#allocation10 + $0x8] sm:$0xff] }
 0x181   : > { %v2592_v40 = vpop.f32.mrf.mxu1  ;;  %v2557_v41 = vpop.f32.mrf.mxu0 }
 0x182   : > { %1112 = vrot.lane.b32.xlu1 %v3479_v38, %s3127_s30  ;;  %2629 = vmatpush3.xpose.msk.msra.mxu1 %vm947_vm1, %v3479_v38 }
 0x183   : > { %2633 = vmatprep.subr.mxu1 %v3125_v0 }
 0x185   : > { %2631 = vmatmul.mubr.msk.f32.vlgmr.msra.gmra.mxu1 %vm947_vm1, %v3481_v39 }
 0x186   : > { %1110 = vrot.lane.b32.xlu1 %v3481_v39, %s3127_s30  ;;  %2635 = vmatprep.mubr.msk.f32.mxu1 %vm3126_vm0, %v3125_v0 }
 0x1a1   : > { %v927_v5 = vpop.f32.mrf.mxu0 }
 0x1a2   : > { %v3518_v6 = vadd.f32 %v2374_v4, %v927_v5 }
 0x1a3   : > { %v2627_v7 = vpop.f32.mrf.mxu0 }
 0x1a4   : > { %2634 = vmatpush3.msra.mxu1 %v3518_v6 }
 0x1a5   : > { %2638 = vmatprep.subr.mxu1 %v3125_v0 }
 0x1f4   : > { %v1113_v10 = vpop.permute.xlu1 %1112 }
 0x1f8   : > { %v1111_v12 = vpop.permute.xlu1 %1110 }
 0x245   : > { %v1020_v58 = vpop.f32.mrf.mxu1 }
 0x246   : > { %v1024_v59 = vmul.f32 0.17677669, %v1020_v58  ;;  %v941_v58 = vld [vmem:[#allocation10 + $0x50] sm:$0xff] }
 0x247   : > { %v2632_v60 = vpop.f32.mrf.mxu1  ;;  %2683 = vmatpush3.msra.mxu0 %v941_v58  ;;  %v1949_v58 = vld [vmem:[#allocation11 + $0x48] sm:$0xff] }
 0x248   : > { %v1026_v61 = vsel %vm1025_vm2, %v1024_v59, -inf  ;;  %2684 = vmatprep.subr.mxu0 %v3125_v0 }
 0x249   : > { %1027 = vmax.xlane.f32.xlu0 %v1026_v61 }
 0x2d2   : > { %v1028_v62 = vpop.xlane.xlu0 %1027 }
 0x2d3   : > { %v1029_v63 = vsub.f32 %v1024_v59, %v1028_v62  ;;  %v940_v59 = vld [vmem:[#allocation10 + $0x48] sm:$0xff] }
 0x2d4   : > { %2685 = vmatpush3.msra.mxu0 %v940_v59  ;;  %v1948_v59 = vld [vmem:[#allocation11 + $0x40] sm:$0xff] }
 0x2d5   : > { %v1030_v1 = vmul.f32 1.442695, %v1029_v63  ;;  %2686 = vmatprep.subr.mxu0 %v3125_v0 }
 0x2d7   : > { %2828 = vpow2.f32 %v1030_v1  ;;  %v939_v1 = vld [vmem:[#allocation10 + $0x40] sm:$0xff] }
 0x2d8   : > { %2687 = vmatpush3.msra.mxu0 %v939_v1  ;;  %v1942_v1 = vld [vmem:[#allocation11 + $0x10] sm:$0xff] }
 0x2d9   : > { %2701 = vmatprep.subr.mxu0 %v3125_v0 }
 0x2e4   : > { %v2829_v2 = vpop.eup %2828 }
 0x2e5   : > { %v1032_v3 = vsel %vm1025_vm2, %v2829_v2, 0.0 }
 0x2e6   : > { %1033 = vadd.xlane.f32.xlu0 %v1032_v3 }
 0x36f   : > { %v1034_v8 = vpop.xlane.xlu0 %1033 }
 0x370   : > { %2830 = vrcp.f32 %v1034_v8 }
 0x37d   : > { %v2831_v9 = vpop.eup %2830 }
 0x37e   : > { %v1036_v11 = vmul.f32 %v2831_v9, %v2829_v2 }
 0x380   : > { %2636 = vmatmul.mubr.msk.f32.vlgmr.msra.gmra.mxu1 %vm1025_vm2, %v1036_v11 }
 0x381   : > { %2639 = vmatpush3.xpose.msk.msra.mxu1 %vm947_vm1, %v1113_v10  ;;  %2640 = vmatprep.mubr.msk.f32.mxu1 %vm3126_vm0, %v3125_v0 }
 0x382   : > { %2643 = vmatprep.subr.mxu1 %v3125_v0 }
 0x384   : > { %2641 = vmatmul.mubr.msk.f32.vlgmr.msra.gmra.mxu1 %vm947_vm1, %v1111_v12 }
 0x385   : > { %2645 = vmatprep.mubr.msk.f32.mxu1 %vm3126_vm0, %v3125_v0 }
 0x440   : > { %v1106_v13 = vpop.f32.mrf.mxu1 }
 0x442   : > { %v2637_v14 = vpop.f32.mrf.mxu1 }
 0x444   : > { %v1184_v15 = vpop.f32.mrf.mxu1 }
 0x445   : > { %v1188_v16 = vmul.f32 0.17677669, %v1184_v15  ;;  %v946_v15 = vld [vmem:[#allocation10 + $0x78] sm:$0xff] }
 0x446   : > { %v2642_v17 = vpop.f32.mrf.mxu1 }
 0x447   : > { %v1189_v18 = vsel %vm1025_vm2, %v1188_v16, -inf }
 0x448   : > { %1190 = vmax.xlane.f32.xlu0 %v1189_v18  ;;  %v944_v18 = vld [vmem:[#allocation10 + $0x68] sm:$0xff] }
 0x45e   : > { %1201 = vrot.lane.b32.xlu0 %v3518_v6, %s3127_s30  ;;  %s2212_s30 = scalar_lea.sflag [#allocation4], %s3402_s5 }
 0x462   : > { %1425 = vrot.lane.b32.xlu0 %v3479_v38, %s3128_s15 }
 0x466   : > { %1423 = vrot.lane.b32.xlu0 %v3481_v39, %s3128_s15 }
 0x4d1   : > { %v1191_v19 = vpop.xlane.xlu0 %1190 }
 0x4d2   : > { %v1192_v20 = vsub.f32 %v1188_v16, %v1191_v19  ;;  %v945_v16 = vld [vmem:[#allocation10 + $0x70] sm:$0xff] }
 0x4d4   : > { %v1193_v21 = vmul.f32 1.442695, %v1192_v20 }
 0x4d5   : > { %v1202_v22 = vpop.permute.xlu0 %1201 }
 0x4d6   : > { %2832 = vpow2.f32 %v1193_v21  ;;  %2644 = vmatpush3.msra.mxu1 %v1202_v22 }
 0x4d7   : > { %2648 = vmatprep.subr.mxu1 %v3125_v0 }
 0x4d9   : > { %v1426_v40 = vpop.permute.xlu0 %1425 }
 0x4dd   : > { %v1424_v41 = vpop.permute.xlu0 %1423 }
 0x4e3   : > { %v2833_v23 = vpop.eup %2832 }
 0x4e4   : > { %v1195_v24 = vsel %vm1025_vm2, %v2833_v23, 0.0 }
 0x4e5   : > { %1196 = vadd.xlane.f32.xlu1 %v1195_v24 }
 0x4f6   : > { %1513 = vrot.lane.b32.xlu1 %v3518_v6, %s3128_s15  ;;  %s3727_s15 = sld [smem:[#allocation30_spill]] }
 0x4fa   : > { %1665 = vrot.lane.b32.xlu1 %v3479_v38, %s3129_s17  ;;  %v931_v38 = vld [vmem:[#allocation10] sm:$0xff] }
 0x56e   : > { %v1197_v25 = vpop.xlane.xlu1 %1196 }
 0x56f   : > { %2834 = vrcp.f32 %v1197_v25 }
 0x572   : > { %v1514_v42 = vpop.permute.xlu1 %1513 }
 0x576   : > { %v1666_v60 = vpop.permute.xlu1 %1665 }
 0x57c   : > { %v2835_v26 = vpop.eup %2834 }
 0x57d   : > { %v1199_v27 = vmul.f32 %v2835_v26, %v2833_v23  ;;  %v943_v23 = vld [vmem:[#allocation10 + $0x60] sm:$0xff] }
 0x57f   : > { %2646 = vmatmul.mubr.msk.f32.vlgmr.msra.gmra.mxu1 %vm1025_vm2, %v1199_v27  ;;  %v2391_v27 = vld [vmem:[%s3666_s8] ss:$0 sm:$0xff] }
 0x580   : > { %2649 = vmatpush3.msra.mxu1 %v938_v28  ;;  %2656 = vmatprep.mubr.msk.f32.mxu1 %vm3126_vm0, %v3125_v0 }
 0x581   : > { %2650 = vmatprep.subr.mxu1 %v3125_v0 }
 0x582   : > { %2651 = vmatpush3.msra.mxu1 %v937_v29 }
 0x583   : > { %2652 = vmatprep.subr.mxu1 %v3125_v0 }
 0x584   : > { %2653 = vmatpush3.msra.mxu1 %v936_v30 }
 0x585   : > { %2654 = vmatprep.subr.mxu1 %v3125_v0 }
 0x586   : > { %2655 = vmatpush3.msra.mxu1 %v935_v31 }
 0x587   : > { %2659 = vmatprep.subr.mxu1 %v3125_v0 }
 0x63f   : > { %v1273_v34 = vpop.f32.mrf.mxu1 }
 0x640   : > { %2657 = vmatmul.mubr.msk.f32.vlgmr.msra.gmra.mxu1 %vm947_vm1, %v1273_v34  ;;  %v1970_v34 = vld [vmem:[#allocation11 + $0xf0] sm:$0xff] }
 0x641   : > { %2660 = vmatpush3.msra.mxu1 %v934_v32  ;;  %v2647_v36 = vpop.f32.mrf.mxu1  ;;  %2667 = vmatprep.mubr.msk.f32.mxu1 %vm3126_vm0, %v3125_v0  ;;  %v1971_v32 = vld [vmem:[#allocation11 + $0xf8] sm:$0xff] }
 0x642   : > { %2661 = vmatprep.subr.mxu1 %v3125_v0  ;;  %v1967_v36 = vld [vmem:[#allocation11 + $0xd8] sm:$0xff] }
 0x643   : > { %2662 = vmatpush3.msra.mxu1 %v933_v35  ;;  %v1968_v35 = vld [vmem:[#allocation11 + $0xe0] sm:$0xff] }
 0x644   : > { %2663 = vmatprep.subr.mxu1 %v3125_v0 }
 0x645   : > { %2664 = vmatpush3.msra.mxu1 %v932_v37  ;;  %v1966_v37 = vld [vmem:[#allocation11 + $0xd0] sm:$0xff] }
 0x646   : > { %2665 = vmatprep.subr.mxu1 %v3125_v0 }
 0x647   : > { %2666 = vmatpush3.msra.mxu1 %v931_v38  ;;  %v1965_v38 = vld [vmem:[#allocation11 + $0xc8] sm:$0xff] }
 0x648   : > { %2668 = vmatmul.mubr.msk.f32.vlgmr.msra.gmra.mxu1 %vm947_vm1, %v1106_v13  ;;  %2670 = vmatprep.subr.mxu1 %v3125_v0 }
 0x649   : > { %2671 = vmatpush3.xpose.msk.msra.mxu1 %vm947_vm1, %v1426_v40  ;;  %2672 = vmatprep.mubr.msk.f32.mxu1 %vm3126_vm0, %v3125_v0  ;;  %v1964_v40 = vld [vmem:[#allocation11 + $0xc0] sm:$0xff] }
 0x64a   : > { %2675 = vmatprep.subr.mxu1 %v3125_v0 }
 0x64c   : > { %2673 = vmatmul.mubr.msk.f32.vlgmr.msra.gmra.mxu1 %vm947_vm1, %v1424_v41 }
 0x64d   : > { %2676 = vmatpush3.msra.mxu1 %v1514_v42  ;;  %2677 = vmatprep.mubr.msk.f32.mxu1 %vm3126_vm0, %v3125_v0 }
 0x64e   : > { %2691 = vmatprep.subr.mxu1 %v3125_v0 }
 0x700   : > { %v1346_v43 = vpop.f32.mrf.mxu1 }
 0x702   : > { %v2658_v44 = vpop.f32.mrf.mxu1 }
 0x703   : > { %v1963_v44 = vld [vmem:[#allocation11 + $0xb8] sm:$0xff] }
 0x708   : > { %v1419_v45 = vpop.f32.mrf.mxu1 }
 0x709   : > { %v3563_v46 = vadd.f32 %v1419_v45, %v1346_v43  ;;  %v1962_v45 = vld [vmem:[#allocation11 + $0xb0] sm:$0xff] }
 0x70a   : > { %v2669_v47 = vpop.f32.mrf.mxu1 }
 0x70b   : > { %v1960_v47 = vld [vmem:[#allocation11 + $0xa0] sm:$0xff] }
 0x70c   : > { %v1497_v48 = vpop.f32.mrf.mxu1 }
 0x70d   : > { %v1501_v49 = vmul.f32 0.17677669, %v1497_v48  ;;  %v1959_v48 = vld [vmem:[#allocation11 + $0x98] sm:$0xff] }
 0x70e   : > { %v2674_v50 = vpop.f32.mrf.mxu1 }
 0x70f   : > { %v1502_v51 = vsel %vm1025_vm2, %v1501_v49, -inf  ;;  %v1957_v50 = vld [vmem:[#allocation11 + $0x88] sm:$0xff] }
 0x710   : > { %1503 = vmax.xlane.f32.xlu0 %v1502_v51  ;;  %v1956_v51 = vld [vmem:[#allocation11 + $0x80] sm:$0xff] }
 0x799   : > { %v1504_v52 = vpop.xlane.xlu0 %1503 }
 0x79a   : > { %v1505_v53 = vsub.f32 %v1501_v49, %v1504_v52  ;;  %v1958_v49 = vld [vmem:[#allocation11 + $0x90] sm:$0xff]  ;;  %v1955_v52 = vld [vmem:[#allocation11 + $0x78] sm:$0xff] }
 0x79c   : > { %v1506_v54 = vmul.f32 1.442695, %v1505_v53  ;;  %v1954_v53 = vld [vmem:[#allocation11 + $0x70] sm:$0xff] }
 0x79e   : > { %2836 = vpow2.f32 %v1506_v54  ;;  %v1953_v54 = vld [vmem:[#allocation11 + $0x68] sm:$0xff] }
 0x7ab   : > { %v2837_v55 = vpop.eup %2836 }
 0x7ac   : > { %v1508_v56 = vsel %vm1025_vm2, %v2837_v55, 0.0 }
 0x7ad   : > { %1509 = vadd.xlane.f32.xlu1 %v1508_v56  ;;  %v1951_v56 = vld [vmem:[#allocation11 + $0x58] sm:$0xff] }
 0x7be   : > { %1663 = vrot.lane.b32.xlu1 %v3481_v39, %s3129_s17 }
 0x836   : > { %v1510_v61 = vpop.xlane.xlu1 %1509 }
 0x837   : > { %2838 = vrcp.f32 %v1510_v61  ;;  %v1946_v61 = vld [vmem:[#allocation11 + $0x30] sm:$0xff] }
 0x83a   : > { %v1664_v39 = vpop.permute.xlu1 %1663 }
 0x844   : > { %v2839_v62 = vpop.eup %2838 }
 0x845   : > { %v1512_v63 = vmul.f32 %v2839_v62, %v2837_v55  ;;  %v1952_v55 = vld [vmem:[#allocation11 + $0x60] sm:$0xff]  ;;  %v1945_v62 = vld [vmem:[#allocation11 + $0x28] sm:$0xff] }
 0x847   : > { %2678 = vmatmul.mubr.msk.f32.vlgmr.msra.gmra.mxu1 %vm1025_vm2, %v1512_v63  ;;  %v1944_v63 = vld [vmem:[#allocation11 + $0x20] sm:$0xff] }
 0x848   : > { %2692 = vmatpush3.xpose.msk.msra.mxu1 %vm947_vm1, %v1666_v60  ;;  %2693 = vmatprep.mubr.msk.f32.mxu1 %vm3126_vm0, %v3125_v0  ;;  %v1947_v60 = vld [vmem:[#allocation11 + $0x38] sm:$0xff] }
 0x849   : > { %2696 = vmatprep.subr.mxu1 %v3125_v0 }
 0x84b   : > { %2694 = vmatmul.mubr.msk.f32.vlgmr.msra.gmra.mxu1 %vm947_vm1, %v1664_v39  ;;  %v1943_v39 = vld [vmem:[#allocation11 + $0x18] sm:$0xff] }
 0x84c   : > { %2698 = vmatprep.mubr.msk.f32.mxu1 %vm3126_vm0, %v3125_v0 }
 0x907   : > { %v1585_v2 = vpop.f32.mrf.mxu1 }
 0x908   : > { %2689 = vmatmul.mubr.msk.f32.vlgmr.msra.gmra.mxu0 %vm947_vm1, %v1585_v2  ;;  %v1941_v2 = vld [vmem:[#allocation11 + $0x8] sm:$0xff] }
 0x909   : > { %v2679_v3 = vpop.f32.mrf.mxu1  ;;  %2709 = vmatprep.mubr.msk.f32.mxu0 %vm3126_vm0, %v3125_v0  ;;  %2702 = vmatpush3.msra.mxu0 %v946_v15  ;;  %v2088_v15 = vld [vmem:[#allocation13 + $0x78] sm:$0xff] }
 0x90a   : > { %2703 = vmatprep.subr.mxu0 %v3125_v0  ;;  %v1940_v3 = vld [vmem:[#allocation11] sm:$0xff] }
 0x90b   : > { %v1737_v4 = vpop.f32.mrf.mxu1  ;;  %2704 = vmatpush3.msra.mxu0 %v945_v16  ;;  %v2103_v16 = vld [vmem:[#allocation13 + $0xf0] sm:$0xff] }
 0x90c   : > { %v1741_v5 = vmul.f32 0.17677669, %v1737_v4  ;;  %2705 = vmatprep.subr.mxu0 %v3125_v0 }
 0x90d   : > { %v2695_v7 = vpop.f32.mrf.mxu1  ;;  %2706 = vmatpush3.msra.mxu0 %v944_v18  ;;  %v2102_v18 = vld [vmem:[#allocation13 + $0xe8] sm:$0xff] }
 0x90e   : > { %v1742_v8 = vsel %vm1025_vm2, %v1741_v5, -inf  ;;  %2707 = vmatprep.subr.mxu0 %v3125_v0 }
 0x90f   : > { %1743 = vmax.xlane.f32.xlu0 %v1742_v8  ;;  %2708 = vmatpush3.msra.mxu0 %v943_v23  ;;  %v2099_v23 = vld [vmem:[#allocation13 + $0xd0] sm:$0xff] }
 0x925   : > { %1753 = vrot.lane.b32.xlu0 %v3518_v6, %s3129_s17 }
 0x998   : > { %v1744_v9 = vpop.xlane.xlu0 %1743 }
 0x999   : > { %v1745_v10 = vsub.f32 %v1741_v5, %v1744_v9  ;;  %v2392_v9 = vld [vmem:[%s3667_s9] ss:$0 sm:$0xff] }
 0x99b   : > { %v1746_v11 = vmul.f32 1.442695, %v1745_v10 }
 0x99c   : > { %v1754_v12 = vpop.permute.xlu0 %1753 }
 0x99d   : > { %2840 = vpow2.f32 %v1746_v11  ;;  %2697 = vmatpush3.msra.mxu1 %v1754_v12  ;;  %v2393_v11 = vld [vmem:[%s3668_s10] ss:$0 sm:$0xff] }
 0x99e   : > { %1984 = vmatprep.subr.mxu1 %v1971_v32  ;;  %v2079_v32 = vld [vmem:[#allocation13 + $0x30] sm:$0xff] }
 0x9aa   : > { %v2841_v13 = vpop.eup %2840 }
 0x9ab   : > { %v1748_v14 = vsel %vm1025_vm2, %v2841_v13, 0.0 }
 0x9ac   : > { %1749 = vadd.xlane.f32.xlu1 %v1748_v14  ;;  %v2104_v14 = vld [vmem:[#allocation13 + $0xf8] sm:$0xff] }
 0x9ad   : > { %2488 = vmatprep.subr.mxu0 %v2104_v14 }
 0x9c8   : > { %v1658_v17 = vpop.f32.mrf.mxu0 }
 0x9c9   : > { %v1662_v19 = vadd.f32 %v1658_v17, %v3563_v46  ;;  %v1961_v46 = vld [vmem:[#allocation11 + $0xa8] sm:$0xff]  ;;  %v2087_v17 = vld [vmem:[#allocation13 + $0x70] sm:$0xff] }
 0x9ca   : > { %v2690_v6 = vpop.f32.mrf.mxu0 }
 0x9cb   : > { %v2101_v6 = vld [vmem:[#allocation13 + $0xe0] sm:$0xff] }
 0xa35   : > { %v1750_v20 = vpop.xlane.xlu1 %1749 }
 0xa36   : > { %2842 = vrcp.f32 %v1750_v20  ;;  %v2085_v20 = vld [vmem:[#allocation13 + $0x60] sm:$0xff] }
 0xa43   : > { %v2843_v21 = vpop.eup %2842 }
 0xa44   : > { %v1752_v22 = vmul.f32 %v2843_v21, %v2841_v13  ;;  %v2100_v21 = vld [vmem:[#allocation13 + $0xd8] sm:$0xff] }
 0xa46   : > { %2699 = vmatmul.mubr.msk.f32.vlgmr.msra.gmra.mxu1 %vm1025_vm2, %v1752_v22  ;;  %v2084_v22 = vld [vmem:[#allocation13 + $0x58] sm:$0xff] }
 0xa47   : > { %2048 = vmatprep.mubr.f32.mxu1 %v3125_v0  ;;  %v1969_v0 = vld [vmem:[#allocation11 + $0xe8] sm:$0xff]  ;;  %1985 = vmatpush1.msra.mxu1 %v1970_v34 }
 0xa48   : > { %1986 = vmatprep.subr.mxu1 %v1969_v0  ;;  %v2094_v34 = vld [vmem:[#allocation13 + $0xa8] sm:$0xff] }
 0xa49   : > { %1987 = vmatpush1.msra.mxu1 %v1968_v35  ;;  %v2078_v0 = vld [vmem:[#allocation13 + $0x28] sm:$0xff]  ;;  %v2093_v35 = vld [vmem:[#allocation13 + $0xa0] sm:$0xff] }
 0xa4a   : > { %1988 = vmatprep.subr.mxu1 %v1967_v36  ;;  %v2077_v36 = vld [vmem:[#allocation13 + $0x20] sm:$0xff] }
 0xa4b   : > { %1989 = vmatpush1.msra.mxu1 %v1966_v37  ;;  %v2092_v37 = vld [vmem:[#allocation13 + $0x98] sm:$0xff] }
 0xa4c   : > { %1990 = vmatprep.subr.mxu1 %v1965_v38  ;;  %v2076_v38 = vld [vmem:[#allocation13 + $0x18] sm:$0xff] }
 0xa4d   : > { %1991 = vmatpush1.msra.mxu1 %v1964_v40  ;;  %v2091_v40 = vld [vmem:[#allocation13 + $0x90] sm:$0xff] }
 0xa4e   : > { %1992 = vmatprep.subr.mxu1 %v1963_v44  ;;  %v2073_v44 = vld [vmem:[#allocation13] sm:$0xff] }
 0xa4f   : > { %1993 = vmatpush1.msra.mxu1 %v1962_v45  ;;  %v1974_v45 = vlaneseq }
 0xa50   : > { %1994 = vmatprep.subr.mxu1 %v1961_v46 }
 0xa51   : > { %1995 = vmatpush1.msra.mxu1 %v1960_v47  ;;  %v1975_v46 = vshrl.u32 %v1974_v45, 7 }
 0xa52   : > { %1996 = vmatprep.subr.mxu1 %v1959_v48  ;;  %v1972_v48 = vld [vmem:[%s3670_s12] sm:$0x3] }
 0xa53   : > { %1997 = vmatpush1.msra.mxu1 %v1958_v49  ;;  %v1976_v47 = vsub.s32 0, %v1975_v46  ;;  %v1980_v49 = vsub.s32 1, %v1975_v46 }
 0xa54   : > { %1998 = vmatprep.subr.mxu1 %v1957_v50 }
 0xa55   : > { %1999 = vmatpush1.msra.mxu1 %v1956_v51  ;;  %v1977_v50 = vrot.slane %v1972_v48, %v1976_v47  ;;  %v1981_v51 = vrot.slane %v1972_v48, %v1980_v49 }
 0xa56   : > { %2000 = vmatprep.subr.mxu1 %v1955_v52 }
 0xa57   : > { %2001 = vmatpush1.msra.mxu1 %v1954_v53 }
 0xa58   : > { %2002 = vmatprep.subr.mxu1 %v1953_v54 }
 0xa59   : > { %2003 = vmatpush1.msra.mxu1 %v1952_v55 }
 0xa5a   : > { %2004 = vmatprep.subr.mxu1 %v1951_v56 }
 0xa5b   : > { %2005 = vmatpush1.msra.mxu1 %v1950_v57 }
 0xa5c   : > { %2006 = vmatprep.subr.mxu1 %v1949_v58 }
 0xa5d   : > { %2007 = vmatpush1.msra.mxu1 %v1948_v59 }
 0xa5e   : > { %2008 = vmatprep.subr.mxu1 %v1947_v60 }
 0xa5f   : > { %2009 = vmatpush1.msra.mxu1 %v1946_v61 }
 0xa60   : > { %2010 = vmatprep.subr.mxu1 %v1945_v62 }
 0xa61   : > { %2011 = vmatpush1.msra.mxu1 %v1944_v63 }
 0xa62   : > { %2012 = vmatprep.subr.mxu1 %v1943_v39 }
 0xa63   : > { %2013 = vmatpush1.msra.mxu1 %v1942_v1 }
 0xa64   : > { %2014 = vmatprep.subr.mxu1 %v1941_v2 }
 0xa65   : > { %2015 = vmatpush1.msra.mxu1 %v1940_v3 }
 0xb06   : > { %v1825_v24 = vpop.f32.mrf.mxu1 }
 0xb07   : > { %2710 = vmatmul.mubr.msk.f32.vlgmr.msra.gmra.mxu0 %vm947_vm1, %v1825_v24  ;;  %v2083_v24 = vld [vmem:[#allocation13 + $0x50] sm:$0xff] }
 0xb08   : > { %v2700_v25 = vpop.f32.mrf.mxu1  ;;  %2489 = vmatpush3.msra.mxu0 %v2088_v15 }
 0xb09   : > { %2490 = vmatprep.subr.mxu0 %v2103_v16  ;;  %v2098_v25 = vld [vmem:[#allocation13 + $0xc8] sm:$0xff] }
 0xb0a   : > { %2491 = vmatpush3.msra.mxu0 %v2087_v17 }
 0xb0b   : > { %2492 = vmatprep.subr.mxu0 %v2102_v18 }
 0xbc7   : > { %v1898_v26 = vpop.f32.mrf.mxu0 }
 0xbc8   : > { %v1902_v28 = vadd.f32 %v1898_v26, %v1662_v19  ;;  %v2086_v19 = vld [vmem:[#allocation13 + $0x68] sm:$0xff] }
 0xbc9   : > { %v2711_v29 = vpop.f32.mrf.mxu0  ;;  %2493 = vmatpush3.msra.mxu0 %v2086_v19  ;;  %v2082_v26 = vld [vmem:[#allocation13 + $0x48] sm:$0xff] }
 0xbca   : > { %v1910_v30 = vadd.f32 %v2391_v27, %v1902_v28  ;;  %2494 = vmatprep.subr.mxu0 %v2101_v6  ;;  %v2097_v27 = vld [vmem:[#allocation13 + $0xc0] sm:$0xff]  ;;  %v2096_v29 = vld [vmem:[#allocation13 + $0xb8] sm:$0xff] }
 0xbcb   : > { %2495 = vmatpush3.msra.mxu0 %v2085_v20  ;;  %v2081_v28 = vld [vmem:[#allocation13 + $0x40] sm:$0xff] }
 0xbcc   : > { %v1911_v31 = vadd.f32 %v1910_v30, %v3461_v33  ;;  %2496 = vmatprep.subr.mxu0 %v2100_v21  ;;  %v2080_v30 = vld [vmem:[#allocation13 + $0x38] sm:$0xff] }
 0xbcd   : > { %2497 = vmatpush3.msra.mxu0 %v2084_v22 }
 0xbce   : > { %1914 = vadd.xlane.f32.xlu0 %v1911_v31  ;;  %2498 = vmatprep.subr.mxu0 %v2099_v23 }
 0xbcf   : > { %2499 = vmatpush3.msra.mxu0 %v2083_v24 }
 0xbd0   : > { %2500 = vmatprep.subr.mxu0 %v2098_v25  ;;  %v2395_v25 = vld [vmem:[%s3727_s15] ss:$0 sm:$0xff]  ;;  %s3040_s15 = sshll.u32 %s3130_s18, 4  ;;  %s3041_s15 = int_to_ptr.vmem [resolvable:$false] %s3040_s15 }
 0xbd1   : > { %2501 = vmatpush3.msra.mxu0 %v2082_v26  ;;  %s3042_s0 = scalar_lea.vmem %s3041_s15, 256  ;;  %p3043_p13 = scmp.lt.s32.totalorder %s2226_s22, %s3041_s15 }
 0xbd2   : > { %2502 = vmatprep.subr.mxu0 %v2097_v27  ;;  %p3044_p5 = scmp.lt.s32.totalorder %s3042_s0, %s3036_s16 }
 0xbd3   : > { %2503 = vmatpush3.msra.mxu0 %v2081_v28 }
 0xbd4   : > { %2504 = vmatprep.subr.mxu0 %v2096_v29  ;;  %p3045_p9 = por %p3044_p5, %p3043_p13 }
 0xbd5   : > { %2505 = vmatpush3.msra.mxu0 %v2080_v30 }
 0xbd6   : > { %p3046_p1 = pnand %p3045_p9, %p3039_p11 }
 0xc57   : > { %v1915_v41 = vpop.xlane.xlu0 %1914 }
 0xc58   : > { %v1917_v42 = vmul.f32 0.0078125, %v1915_v41  ;;  %v2075_v41 = vld [vmem:[#allocation13 + $0x10] sm:$0xff] }
 0xc5a   : > { %v1918_v33 = vsub.f32 %v1911_v31, %v1917_v42  ;;  %v2095_v31 = vld [vmem:[#allocation13 + $0xb0] sm:$0xff]  ;;  %v2090_v42 = vld [vmem:[#allocation13 + $0x88] sm:$0xff] }
 0xc5b   : > { %2506 = vmatprep.subr.mxu0 %v2095_v31 }
 0xc5c   : > { %v1919_v43 = vmul.f32 %v1918_v33, %v1918_v33  ;;  %2507 = vmatpush3.msra.mxu0 %v2079_v32 }
 0xc5d   : > { %2508 = vmatprep.subr.mxu0 %v2094_v34 }
 0xc5e   : > { %1920 = vadd.xlane.f32.xlu1 %v1919_v43  ;;  %2509 = vmatpush3.msra.mxu0 %v2078_v0  ;;  %v2089_v43 = vld [vmem:[#allocation13 + $0x80] sm:$0xff] }
 0xc5f   : > { %2510 = vmatprep.subr.mxu0 %v2093_v35 }
 0xc60   : > { %2511 = vmatpush3.msra.mxu0 %v2077_v36 }
 0xc61   : > { %2512 = vmatprep.subr.mxu0 %v2092_v37 }
 0xc62   : > { %2513 = vmatpush3.msra.mxu0 %v2076_v38 }
 0xc63   : > { %2514 = vmatprep.subr.mxu0 %v2091_v40 }
 0xc64   : > { %2515 = vmatpush3.msra.mxu0 %v2075_v41 }
 0xc65   : > { %2516 = vmatprep.subr.mxu0 %v2090_v42 }
 0xce7   : > { %v1921_v4 = vpop.xlane.xlu1 %1920 }
 0xce8   : > { %v1922_v5 = vmul.f32 0.0078125, %v1921_v4 }
 0xcea   : > { %v1923_v7 = vadd.f32 1e-12, %v1922_v5 }
 0xcec   : > { %2844 = vrsqrt.f32 %v1923_v7 }
 0xcf9   : > { %v2845_v8 = vpop.eup %2844 }
 0xcfa   : > { %v1925_v10 = vmul.f32 %v2845_v8, %v1918_v33  ;;  %v2074_v33 = vld [vmem:[#allocation13 + $0x8] sm:$0xff] }
 0xcfb   : > { %2517 = vmatpush3.msra.mxu0 %v2074_v33 }
 0xcfc   : > { %v1932_v12 = vmul.f32 %v2392_v9, %v1925_v10  ;;  %2518 = vmatprep.subr.mxu0 %v2089_v43 }
 0xcfd   : > { %2519 = vmatpush3.msra.mxu0 %v2073_v44 }
 0xcfe   : > { %v3605_v13 = vadd.f32 %v2393_v11, %v1932_v12  ;;  %v2394_v12 = vld [vmem:[%s3672_s14] ss:$0 sm:$0xff] }
 0xd00   : > { %2049 = vmatmul.mubr.f32.vlgmr.msra.gmra.mxu1 %v3605_v13 }
 0xdc0   : > { %v2050_v52 = vpop.f32.mrf.mxu1 }
 0xdc1   : > { %v2051_v53 = vadd.f32 %v2050_v52, %v1977_v50 }
 0xdc2   : > { %v2052_v54 = vpop.f32.mrf.mxu1 }
 0xdc3   : > { %v2057_v55 = vmul.f32 0.044715, %v2051_v53  ;;  %v2053_v56 = vadd.f32 %v2052_v54, %v1981_v51  ;;  %v2055_v8 = vmul.f32 0.5, %v2051_v53 }
 0xdc5   : > { %v2059_v57 = vmul.f32 %v2057_v55, %v2051_v53  ;;  %v2058_v58 = vmul.f32 0.044715, %v2053_v56  ;;  %v2056_v5 = vmul.f32 0.5, %v2053_v56 }
 0xdc7   : > { %v2061_v59 = vmul.f32 %v2059_v57, %v2051_v53  ;;  %v2060_v60 = vmul.f32 %v2058_v58, %v2053_v56 }
 0xdc9   : > { %v2063_v61 = vadd.f32 %v2061_v59, %v2051_v53  ;;  %v2062_v62 = vmul.f32 %v2060_v60, %v2053_v56 }
 0xdcb   : > { %v2064_v63 = vadd.f32 %v2062_v62, %v2053_v56  ;;  %v2065_v39 = vmul.f32 0.7978846, %v2063_v61 }
 0xdcd   : > { %v2066_v1 = vmul.f32 0.7978846, %v2064_v63  ;;  %2846 = vtanh.f32 %v2065_v39 }
 0xdcf   : > { %2848 = vtanh.f32 %v2066_v1 }
 0xdda   : > { %v2847_v2 = vpop.eup %2846 }
 0xddb   : > { %v2069_v4 = vadd.f32 1.0, %v2847_v2 }
 0xddc   : > { %v2849_v3 = vpop.eup %2848 }
 0xddd   : > { %v2070_v7 = vadd.f32 1.0, %v2849_v3  ;;  %v2071_v10 = vmul.f32 %v2069_v4, %v2055_v8 }
 0xddf   : > { %v2072_v9 = vmul.f32 %v2070_v7, %v2056_v5 }
 0xde1   : > { %2176 = vmatprep.mubr.f32.mxu0 %v2072_v9 }
 0xde2   : > { %2177 = vmatmul.mubr.f32.vlgmr.msra.gmra.mxu0 %v2071_v10 }
 0xea2   : > { %v2520_v11 = vpop.f32.mrf.mxu0 }
 0xea4   : > { %v2521_v14 = vpop.f32.mrf.mxu0 }
 0xea5   : > { %v2522_v15 = vadd.f32 %v2521_v14, %v2520_v11 }
 0xea7   : > { %v2179_v16 = vadd.f32 %v2522_v15, %v2394_v12 }
 0xea9   : > { %v2182_v17 = vadd.f32 %v2179_v16, %v3605_v13  ;;  %v2396_v13 = vld [vmem:[%s3728_s29] ss:$0 sm:$0xff] }
 0xeab   : > { %2185 = vadd.xlane.f32.xlu1 %v2182_v17 }
 0xf34   : > { %v2186_v18 = vpop.xlane.xlu1 %2185 }
 0xf35   : > { %v2187_v19 = vmul.f32 0.0078125, %v2186_v18 }
 0xf37   : > { %v2188_v6 = vsub.f32 %v2182_v17, %v2187_v19 }
 0xf39   : > { %v2189_v20 = vmul.f32 %v2188_v6, %v2188_v6 }
 0xf3b   : > { %2190 = vadd.xlane.f32.xlu1 %v2189_v20 }
 0xfc4   : > { %v2191_v21 = vpop.xlane.xlu1 %2190 }
 0xfc5   : > { %v2192_v22 = vmul.f32 0.0078125, %v2191_v21 }
 0xfc7   : > { %v2193_v23 = vadd.f32 1e-12, %v2192_v22 }
 0xfc9   : > { %2850 = vrsqrt.f32 %v2193_v23 }
 0xfd6   : > { %v2851_v24 = vpop.eup %2850 }
 0xfd7   : > { %v2195_v26 = vmul.f32 %v2851_v24, %v2188_v6 }
 0xfd9   : > { %v2202_v27 = vmul.f32 %v2395_v25, %v2195_v26 }
 0xfdb   : > { %v2209_v28 = vadd.f32 %v2396_v13, %v2202_v27 }
 0xfdd   : > { %2210 = vst [vmem:[%s650_s26] sm:$0xff] %v2209_v28 }
 0xfde   : > { %3049 = shalt.err (!%p3046_p1)
}
 0xfdf   : > { %s3050_s21 = scalar_lea.hbm %s2223_s13, 128  ;;  %s3054_s1 = scalar_lea.hbm %s3729_s11, 256 }
 0xfe0   : > { %p3051_p3 = scmp.ne.s32.totalorder %s2223_s13, %s3050_s21  ;;  %p3055_p12 = scmp.lt.s32.totalorder %s2223_s13, %s3729_s11 }
 0xfe1   : > { %p3056_p0 = scmp.lt.s32.totalorder %s3054_s1, %s3050_s21 }
 0xfe2   : > { %p3052_p4 = pnand %p3051_p3, %p3730_p10 }
 0xfe3   : > { %p3057_p7 = por %p3056_p0, %p3055_p12 }
 0xfe4   : > { %p3053_p6 = pneg %p3052_p4 }
 0xfe6   : > { %p3058_p2 = pnand %p3057_p7, %p3053_p6 }
 0xfe8   : > { %3061 = shalt.err (!%p3058_p2)
}
 0xfe9   : > { %2738 = dma.vmem_to_hbm [thread:$0]  (%p3730_p10), %s2226_s22, 128, %s2223_s13, %s2212_s30  }
 0xfea PF: > { %s2237_s26 = sand.u32 1, %s3100_s24   ;;  %p3731_p8 = scmp.ne.s32.totalorder %s3716_s19, 0 }
 0xfeb   : > { %p3732_p11 = scmp.ge.s32.totalorder %s3112_s27, 2  ;;  %s2238_s3 = scalar_lea.sflag [#allocation4], %s2237_s26 }
 0xfed   : > { %p2764_p13 = pnand %p3732_p11, %p3731_p8 }
 0xfef   : > { %p2765_p5 = pneg %p2764_p13 }
 0xff1   : > { %3095 = dma.done.wait (%p2765_p5), %s2238_s3, 128  }
 0xff2   : > { %3097 = vsyncadd (%p2765_p5), %s2238_s3, 4294967168  ;;  %s3733_s27 = sld [smem:[#allocation21_spill]]  ;;  %s3736_s24 = smov %s3104_s25 }
 0xff3   : > { %s3734_s7 = sld [smem:[#allocation20_spill]] }
 0xff4   : > { %s3735_s26 = sld [smem:[#allocation22_spill]] }
 0xff8   : > { %p33_p9 = scmp.ge.s32.totalorder %s3733_s27, 4  }
 0xff9   : > { %s3737_s25 = smov %s3734_s7 }
 0xffa   :  { %35 = sbr.rel (!%p33_p9) target bundleno = 19 (0x13), region = 157 }
 0xfff   :  { %2243 = vsyncpa [#allocation3], 1 }
0x1000   :  { %2245 = vsyncpa [#allocation3 + $0x1], 1 }
0x1001   :  { %2246 = vsyncpa [#allocation6], 1 }
0x1002   :  { %2247 = vsyncpa [#allocation9], 1 }
0x1003   :  { %2248 = vsyncpa [#allocation12], 1 }
0x1004   :  { %2249 = vsyncpa [#allocation4], 1 }
0x1005   :  { %2251 = vsyncpa [#allocation4 + $0x1], 1 }

</bundles_post_ra>
